<compile_context>
chip_gen: v7x
topology: tpu7x:2x2x1
jax: 0.10.0
libtpu: 0.0.40
codegen_flags: <defaults>
</compile_context>

<pallas_src>
import functools

import jax
import jax.numpy as jnp
from jax.experimental import pallas as pl
from jax.experimental.pallas import tpu as pltpu


def _deepset_kernel(ui_ref, um_ref, img_ref, wu_ref, bu_ref, wi_ref, bi_ref,
                    u_out_ref, i_out_ref):
    bt, n_set, t = ui_ref.shape            # (batch tile, N, 1536)

    um = um_ref[...]                                                  # (bt, N) f32
    counts = jnp.maximum(jnp.sum(um, axis=1, keepdims=True), 1.0)     # clamp_min(1)
    inv_counts = 1.0 / counts                                         # exact divide

    # Masked SUM over the set axis in sublane-sized chunks: one (bt, ch, T)
    # product + XLU sublane reduce per chunk, instead of a vld/vst accumulator
    # update per set element or a full (bt, N, T) masked temp.
    CH = 8
    pooled = jnp.zeros((bt, t), jnp.float32)
    for n0 in range(0, n_set, CH):
        n1 = min(n0 + CH, n_set)
        chunk = ui_ref[:, n0:n1, :]                                   # (bt, ch, T)
        mask = um[:, n0:n1, None]                                     # (bt, ch, 1), hoisted
        pooled = pooled + jnp.sum(chunk * mask, axis=1)               # (bt, T)

    # Two MXU dots against the resident (lane-padded) weights. The /counts
    # normalization is linear, so it is applied after the matmul on the small
    # (bt, d_out) tile (exact in f32), before the per-layer bias.
    u = jnp.dot(pooled, wu_ref[...], preferred_element_type=jnp.float32)
    u_out_ref[...] = u * inv_counts + bu_ref[...]

    i = jnp.dot(img_ref[...], wi_ref[...], preferred_element_type=jnp.float32)
    i_out_ref[...] = i + bi_ref[...]


def _round_up(x, m):
    return ((x + m - 1) // m) * m


def _vmem_capacity_bytes():
    try:
        return int(pltpu.get_tpu_info().vmem_capacity_bytes)
    except Exception:
        return None


def _pick_tiling(B, N, T, d_out):
    """Generation-aware VMEM limit and batch tile (multiple of 8, >=2 grid
    steps when the batch allows it)."""
    cap = _vmem_capacity_bytes()
    if cap is not None and cap > 80 * (1 << 20):   # 128 MiB parts (v5e / v6e)
        vmem_limit = 96 * (1 << 20)
    else:                                          # 64 MiB parts (v7x) or unknown
        vmem_limit = 48 * (1 << 20)
    budget = int(vmem_limit * 0.6)

    fixed = 4 * (2 * T * d_out + 2 * d_out)        # resident weights + biases (1-buffered)
    per_row = 4 * (2 * N * T                       # user_images block, double-buffered
                   + 2 * T                         # images block, double-buffered
                   + 2 * N                         # mask block, double-buffered
                   + 4 * d_out                     # two f32 output blocks, double-buffered
                   + 16 * T)                       # in-kernel f32 temps (chunk product, pooled)

    bt = (budget - fixed) // per_row
    bt = max(8, min(1024, (bt // 8) * 8))

    if bt >= B:
        if B >= 16:
            # Keep >=2 grid steps so v7x's second TensorCore gets work and the
            # DMA pipeline has something to overlap.
            bt = max(8, _round_up(pl.cdiv(B, 2), 8))
        else:
            bt = B                                 # tiny batch: single full-block step
    return bt, vmem_limit


@functools.partial(jax.jit, static_argnames=("b_tile",))
def deepset_embedding_block(user_images, user_masks, images,
                            rho_w, rho_b, img_w, img_b, *, b_tile=None):
    """Pallas implementation of DeepSetEmbeddingBlock.forward.

    user_images: (B, N, T) float32, T = 1536
    user_masks:  (B, N)    float   (1.0 valid / 0.0 padding)
    images:      (B, T)    float32
    rho_w/img_w: (T, d)    float32 (transposed PyTorch weight)
    rho_b/img_b: (1, d)    float32
    Returns (u_embeddings (B, d), img_embeddings (B, d)), float32.
    """
    B, N, T = user_images.shape
    d = rho_w.shape[1]
    d_out = _round_up(d, 128)                      # lane-dense matmul outputs / writeback

    # Stream activations in their native f32 (no extra cast pass over HBM).
    ui = user_images.astype(jnp.float32)
    um = user_masks.astype(jnp.float32)
    img = images.astype(jnp.float32)

    # Lane-pad the SMALL parameters with zero columns (sliced off below).
    pad = d_out - d
    wu = jnp.pad(rho_w.astype(jnp.float32), ((0, 0), (0, pad)))
    wi = jnp.pad(img_w.astype(jnp.float32), ((0, 0), (0, pad)))
    bu = jnp.pad(rho_b.reshape(1, d).astype(jnp.float32), ((0, 0), (0, pad)))
    bi = jnp.pad(img_b.reshape(1, d).astype(jnp.float32), ((0, 0), (0, pad)))

    if b_tile is None:
        bt, vmem_limit = _pick_tiling(B, N, T, d_out)
    else:
        bt = min(int(b_tile), B)
        if bt < B:
            bt = max(8, (bt // 8) * 8)
        _, vmem_limit = _pick_tiling(B, N, T, d_out)

    resident = pl.Buffered(1)   # constant-index operands: single VMEM buffer

    u_out, i_out = pl.pallas_call(
        _deepset_kernel,
        out_shape=(jax.ShapeDtypeStruct((B, d_out), jnp.float32),
                   jax.ShapeDtypeStruct((B, d_out), jnp.float32)),
        grid=(pl.cdiv(B, bt),),                    # ragged last block handled by Pallas
        in_specs=[
            pl.BlockSpec((bt, N, T), lambda i: (i, 0, 0)),                    # user_images
            pl.BlockSpec((bt, N), lambda i: (i, 0)),                          # user_masks
            pl.BlockSpec((bt, T), lambda i: (i, 0)),                          # images
            pl.BlockSpec((T, d_out), lambda i: (0, 0), pipeline_mode=resident),  # rho_w
            pl.BlockSpec((1, d_out), lambda i: (0, 0), pipeline_mode=resident),  # rho_b
            pl.BlockSpec((T, d_out), lambda i: (0, 0), pipeline_mode=resident),  # img_w
            pl.BlockSpec((1, d_out), lambda i: (0, 0), pipeline_mode=resident),  # img_b
        ],
        out_specs=(pl.BlockSpec((bt, d_out), lambda i: (i, 0)),
                   pl.BlockSpec((bt, d_out), lambda i: (i, 0))),
        compiler_params=pltpu.CompilerParams(
            dimension_semantics=("parallel",),     # shard B across v7x's 2 TCs
            vmem_limit_bytes=vmem_limit,
        ),
    )(ui, um, img, wu, bu, wi, bi)

    return u_out[:, :d], i_out[:, :d]


def _reference(user_images, user_masks, images, rho_w, rho_b, img_w, img_b):
    """Pure-JAX reference mirroring the PyTorch forward semantics (f32)."""
    phi_x = user_images                                                 # nn.Identity
    phi_mask = phi_x * user_masks[:, :, None]
    counts = jnp.maximum(jnp.sum(user_masks, axis=1, keepdims=True), 1.0)
    aggregated = jnp.sum(phi_mask, axis=1) / counts
    hp = jax.lax.Precision.HIGHEST
    u_emb = jnp.dot(aggregated, rho_w, precision=hp) + rho_b
    i_emb = jnp.dot(images, img_w, precision=hp) + img_b
    return u_emb, i_emb


if __name__ == "__main__":
    # Small but module-consistent shapes: embedding size T must be 1536
    # (the module hard-codes nn.Linear(1536, d)).
    B, N, T, D = 2, 8, 1536, 32

    key = jax.random.PRNGKey(0)
    k_ui, k_img, k_rw, k_rb, k_iw, k_ib = jax.random.split(key, 6)

    user_images = jax.random.normal(k_ui, (B, N, T), dtype=jnp.float32)
    images = jax.random.normal(k_img, (B, T), dtype=jnp.float32)
    # Deterministic mask: first sample has 5 valid images, second has 3.
    valid = jnp.array([5, 3], dtype=jnp.int32)
    user_masks = (jnp.arange(N)[None, :] < valid[:, None]).astype(jnp.float32)

    # Deterministic parameter init (PyTorch-Linear-like uniform bound 1/sqrt(T)).
    bound = 1.0 / (T ** 0.5)
    rho_w = jax.random.uniform(k_rw, (T, D), jnp.float32, -bound, bound)
    rho_b = jax.random.uniform(k_rb, (1, D), jnp.float32, -bound, bound)
    img_w = jax.random.uniform(k_iw, (T, D), jnp.float32, -bound, bound)
    img_b = jax.random.uniform(k_ib, (1, D), jnp.float32, -bound, bound)

    u_emb, i_emb = deepset_embedding_block(
        user_images, user_masks, images, rho_w, rho_b, img_w, img_b)
    jax.block_until_ready((u_emb, i_emb))

    u_ref, i_ref = _reference(user_images, user_masks, images,
                              rho_w, rho_b, img_w, img_b)

    assert u_emb.shape == (B, D) and i_emb.shape == (B, D)
    assert jnp.allclose(u_emb, u_ref, atol=1e-2, rtol=1e-2), \
        float(jnp.max(jnp.abs(u_emb - u_ref)))
    assert jnp.allclose(i_emb, i_ref, atol=1e-2, rtol=1e-2), \
        float(jnp.max(jnp.abs(i_emb - i_ref)))

    print("KERNEL_OK")
</pallas_src>

<mosaic_0001>
module attributes {stable_mosaic.version = 11 : i64} {
  func.func @_deepset_kernel(%arg0: i32, %arg1: memref<2x8x1536xf32, #tpu.memory_space<vmem>>, %arg2: memref<2x8xf32, #tpu.memory_space<vmem>>, %arg3: memref<2x1536xf32, #tpu.memory_space<vmem>>, %arg4: memref<1536x128xf32, #tpu.memory_space<vmem>>, %arg5: memref<1x128xf32, #tpu.memory_space<vmem>>, %arg6: memref<1536x128xf32, #tpu.memory_space<vmem>>, %arg7: memref<1x128xf32, #tpu.memory_space<vmem>>, %arg8: memref<2x128xf32, #tpu.memory_space<vmem>>, %arg9: memref<2x128xf32, #tpu.memory_space<vmem>>) attributes {dimension_semantics = [#tpu.dimension_semantics<parallel>], iteration_bounds = array<i64: 1>, scalar_prefetch = 0 : i64, scratch_operands = 0 : i64, tpu.core_type = #tpu.core_type<tc>, window_params = [{transform_indices = @transform_0, window_bounds = array<i64: 2, 8, 1536>}, {transform_indices = @transform_1, window_bounds = array<i64: 2, 8>}, {transform_indices = @transform_2, window_bounds = array<i64: 2, 1536>}, {pipeline_mode = #tpu.pipeline_mode<synchronous>, transform_indices = @transform_3, window_bounds = array<i64: 1536, 128>}, {pipeline_mode = #tpu.pipeline_mode<synchronous>, transform_indices = @transform_4, window_bounds = array<i64: 1, 128>}, {pipeline_mode = #tpu.pipeline_mode<synchronous>, transform_indices = @transform_5, window_bounds = array<i64: 1536, 128>}, {pipeline_mode = #tpu.pipeline_mode<synchronous>, transform_indices = @transform_6, window_bounds = array<i64: 1, 128>}, {transform_indices = @transform_7, window_bounds = array<i64: 2, 128>}, {transform_indices = @transform_8, window_bounds = array<i64: 2, 128>}]} {
    %c0 = arith.constant 0 : index
    %c0_0 = arith.constant 0 : index
    %0 = vector.load %arg2[%c0, %c0_0] : memref<2x8xf32, #tpu.memory_space<vmem>>, vector<2x8xf32>
    %cst = arith.constant dense<0.000000e+00> : vector<2xf32>
    %1 = vector.multi_reduction <add>, %0, %cst [1] : vector<2x8xf32> to vector<2xf32>
    %2 = vector.shape_cast %1 : vector<2xf32> to vector<2x1xf32>
    %cst_1 = arith.constant 1.000000e+00 : f32
    %3 = vector.broadcast %cst_1 : f32 to vector<2x1xf32>
    %4 = arith.maximumf %2, %3 : vector<2x1xf32>
    %cst_2 = arith.constant 1.000000e+00 : f32
    %5 = vector.broadcast %cst_2 : f32 to vector<2x1xf32>
    %6 = arith.divf %5, %4 : vector<2x1xf32>
    %cst_3 = arith.constant 0.000000e+00 : f32
    %7 = vector.broadcast %cst_3 : f32 to vector<2x1536xf32>
    %c0_4 = arith.constant 0 : index
    %c0_5 = arith.constant 0 : index
    %c0_6 = arith.constant 0 : index
    %8 = vector.load %arg1[%c0_4, %c0_5, %c0_6] : memref<2x8x1536xf32, #tpu.memory_space<vmem>>, vector<2x8x1536xf32>
    %9 = vector.shape_cast %0 : vector<2x8xf32> to vector<2x8x1xf32>
    %10 = vector.broadcast %9 : vector<2x8x1xf32> to vector<2x8x1536xf32>
    %11 = arith.mulf %8, %10 : vector<2x8x1536xf32>
    %cst_7 = arith.constant dense<0.000000e+00> : vector<2x1536xf32>
    %12 = vector.multi_reduction <add>, %11, %cst_7 [1] : vector<2x8x1536xf32> to vector<2x1536xf32>
    %13 = arith.addf %7, %12 : vector<2x1536xf32>
    %c0_8 = arith.constant 0 : index
    %c0_9 = arith.constant 0 : index
    %14 = vector.load %arg4[%c0_8, %c0_9] : memref<1536x128xf32, #tpu.memory_space<vmem>>, vector<1536x128xf32>
    %cst_10 = arith.constant dense<0.000000e+00> : vector<2x128xf32>
    %15 = tpu.matmul %13, %14, %cst_10 {dimension_numbers = #tpu.dot_dimension_numbers<[1], [0], [0], [1], [0, 0, 1, 1], [], []>} : vector<2x1536xf32>, vector<1536x128xf32>, vector<2x128xf32> -> vector<2x128xf32>
    %16 = vector.broadcast %6 : vector<2x1xf32> to vector<2x128xf32>
    %17 = arith.mulf %15, %16 : vector<2x128xf32>
    %c0_11 = arith.constant 0 : index
    %c0_12 = arith.constant 0 : index
    %18 = vector.load %arg5[%c0_11, %c0_12] : memref<1x128xf32, #tpu.memory_space<vmem>>, vector<1x128xf32>
    %19 = vector.broadcast %18 : vector<1x128xf32> to vector<2x128xf32>
    %20 = arith.addf %17, %19 : vector<2x128xf32>
    %c0_13 = arith.constant 0 : index
    %c0_14 = arith.constant 0 : index
    %21 = vector.load %arg8[%c0_13, %c0_14] : memref<2x128xf32, #tpu.memory_space<vmem>>, vector<2x128xf32>
    tpu.vector_store %arg8[%c0_13, %c0_14], %20 {strides = array<i32>} : memref<2x128xf32, #tpu.memory_space<vmem>>, vector<2x128xf32>,
    %c0_15 = arith.constant 0 : index
    %c0_16 = arith.constant 0 : index
    %22 = vector.load %arg3[%c0_15, %c0_16] : memref<2x1536xf32, #tpu.memory_space<vmem>>, vector<2x1536xf32>
    %c0_17 = arith.constant 0 : index
    %c0_18 = arith.constant 0 : index
    %23 = vector.load %arg6[%c0_17, %c0_18] : memref<1536x128xf32, #tpu.memory_space<vmem>>, vector<1536x128xf32>
    %cst_19 = arith.constant dense<0.000000e+00> : vector<2x128xf32>
    %24 = tpu.matmul %22, %23, %cst_19 {dimension_numbers = #tpu.dot_dimension_numbers<[1], [0], [0], [1], [0, 0, 1, 1], [], []>} : vector<2x1536xf32>, vector<1536x128xf32>, vector<2x128xf32> -> vector<2x128xf32>
    %c0_20 = arith.constant 0 : index
    %c0_21 = arith.constant 0 : index
    %25 = vector.load %arg7[%c0_20, %c0_21] : memref<1x128xf32, #tpu.memory_space<vmem>>, vector<1x128xf32>
    %26 = vector.broadcast %25 : vector<1x128xf32> to vector<2x128xf32>
    %27 = arith.addf %24, %26 : vector<2x128xf32>
    %c0_22 = arith.constant 0 : index
    %c0_23 = arith.constant 0 : index
    %28 = vector.load %arg9[%c0_22, %c0_23] : memref<2x128xf32, #tpu.memory_space<vmem>>, vector<2x128xf32>
    tpu.vector_store %arg9[%c0_22, %c0_23], %27 {strides = array<i32>} : memref<2x128xf32, #tpu.memory_space<vmem>>, vector<2x128xf32>,
    return
  }
  func.func @transform_0(%arg0: i32) -> (i32, i32, i32) {
    %c0_i32 = arith.constant 0 : i32
    %c0_i32_0 = arith.constant 0 : i32
    %c0_i32_1 = arith.constant 0 : i32
    return %arg0, %c0_i32, %c0_i32_0 : i32, i32, i32
  }
  func.func @transform_1(%arg0: i32) -> (i32, i32) {
    %c0_i32 = arith.constant 0 : i32
    %c0_i32_0 = arith.constant 0 : i32
    return %arg0, %c0_i32 : i32, i32
  }
  func.func @transform_2(%arg0: i32) -> (i32, i32) {
    %c0_i32 = arith.constant 0 : i32
    %c0_i32_0 = arith.constant 0 : i32
    return %arg0, %c0_i32 : i32, i32
  }
  func.func @transform_3(%arg0: i32) -> (i32, i32) {
    %c0_i32 = arith.constant 0 : i32
    %c0_i32_0 = arith.constant 0 : i32
    %c0_i32_1 = arith.constant 0 : i32
    return %c0_i32, %c0_i32_0 : i32, i32
  }
  func.func @transform_4(%arg0: i32) -> (i32, i32) {
    %c0_i32 = arith.constant 0 : i32
    %c0_i32_0 = arith.constant 0 : i32
    %c0_i32_1 = arith.constant 0 : i32
    return %c0_i32, %c0_i32_0 : i32, i32
  }
  func.func @transform_5(%arg0: i32) -> (i32, i32) {
    %c0_i32 = arith.constant 0 : i32
    %c0_i32_0 = arith.constant 0 : i32
    %c0_i32_1 = arith.constant 0 : i32
    return %c0_i32, %c0_i32_0 : i32, i32
  }
  func.func @transform_6(%arg0: i32) -> (i32, i32) {
    %c0_i32 = arith.constant 0 : i32
    %c0_i32_0 = arith.constant 0 : i32
    %c0_i32_1 = arith.constant 0 : i32
    return %c0_i32, %c0_i32_0 : i32, i32
  }
  func.func @transform_7(%arg0: i32) -> (i32, i32) {
    %c0_i32 = arith.constant 0 : i32
    %c0_i32_0 = arith.constant 0 : i32
    return %arg0, %c0_i32 : i32, i32
  }
  func.func @transform_8(%arg0: i32) -> (i32, i32) {
    %c0_i32 = arith.constant 0 : i32
    %c0_i32_0 = arith.constant 0 : i32
    return %arg0, %c0_i32 : i32, i32
  }
}

</mosaic_0001>

<bundles_post_ra>
// kernel: deepset_embedding_block.1
= control target key start
LH: loop header
LB: loop body
LE: loop exit
PB: predicated region body
PF: predicated region fallthrough
CT: control target
= control target key end

     0   :  { %14 = vsyncpa [#allocation3], 0  ;;  %v62_v0 = vlaneseq  ;;  %s4206_s0 = inlined_call_operand.vmem [shape: f32[2,8,1536], index: 0, kind: input, shape index: {}]   ;;  %s4207_s1 = inlined_call_operand.vmem [shape: f32[2,8], index: 1, kind: input, shape index: {}]   ;;  %s4208_s2 = inlined_call_operand.vmem [shape: f32[2,1536], index: 2, kind: input, shape index: {}]   ;;  %s4209_s3 = inlined_call_operand.vmem [shape: f32[1536,128], index: 3, kind: input, shape index: {}]   ;;  %s4210_s4 = inlined_call_operand.vmem [shape: f32[1,128], index: 4, kind: input, shape index: {}]   ;;  %s4211_s5 = inlined_call_operand.vmem [shape: f32[1536,128], index: 5, kind: input, shape index: {}]   ;;  %s4212_s6 = inlined_call_operand.vmem [shape: f32[1,128], index: 6, kind: input, shape index: {}]   ;;  %s4213_s7 = inlined_call_operand.hbm [shape: f32[2,128], index: 7, kind: output, shape index: {0}]   ;;  %s4214_s8 = inlined_call_operand.hbm [shape: f32[2,128], index: 8, kind: output, shape index: {1}]  }
   0x1   :  { %v284_v1 = vld [vmem:[%s4209_s3 + $0x80] sm:$0xff]  ;;  %v285_v2 = vld [vmem:[%s4209_s3 + $0x88] sm:$0xff]  ;;  %v286_v15 = vld [vmem:[%s4209_s3 + $0x90] sm:$0xff] }
   0x2   :  { %v2575_v3 = vld [vmem:[%s4207_s1] sm:$0x3]  ;;  %v2078_v4 = vpack.c.bf16 %v285_v2, %v284_v1  ;;  %v317_v6 = vld [vmem:[%s4209_s3 + $0x188] sm:$0xff]  ;;  %v2586_v8 = vshrl.u32 %v62_v0, 7  ;;  %v287_v16 = vld [vmem:[%s4209_s3 + $0x98] sm:$0xff] }
   0x3   :  { %v316_v5 = vld [vmem:[%s4209_s3 + $0x180] sm:$0xff]  ;;  %v269_v10 = vld [vmem:[%s4209_s3 + $0x8] sm:$0xff]  ;;  %v318_v17 = vld [vmem:[%s4209_s3 + $0x190] sm:$0xff]  ;;  %v2082_v20 = vpack.c.bf16 %v287_v16, %v286_v15 }
   0x4   :  { %v268_v7 = vld [vmem:[%s4209_s3] sm:$0xff]  ;;  %4218 = vst [vmem:[#allocation8_spill] sm:$0xff] %v2586_v8  ;;  %v2110_v9 = vpack.c.bf16 %v317_v6, %v316_v5  ;;  %v301_v12 = vld [vmem:[%s4209_s3 + $0x108] sm:$0xff]  ;;  %2079 = vmatprep.subr.bf16.mxu0 %v2078_v4  ;;  %v64_v18 = vsub.s32 0, %v2586_v8  ;;  %v71_v19 = vsub.s32 1, %v2586_v8  ;;  %v319_v21 = vld [vmem:[%s4209_s3 + $0x198] sm:$0xff] }
   0x5   :  { %v300_v11 = vld [vmem:[%s4209_s3 + $0x100] sm:$0xff]  ;;  %v2080_v13 = vpack.c.bf16 %v269_v10, %v268_v7  ;;  %v270_v22 = vld [vmem:[%s4209_s3 + $0x10] sm:$0xff]  ;;  %v271_v23 = vld [vmem:[%s4209_s3 + $0x18] sm:$0xff]  ;;  %v2114_v24 = vpack.c.bf16 %v319_v21, %v318_v17 }
   0x6   :  { %v2112_v14 = vpack.c.bf16 %v301_v12, %v300_v11  ;;  %2111 = vmatprep.subr.bf16.mxu1 %v2110_v9  ;;  %v2084_v25 = vpack.c.bf16 %v271_v23, %v270_v22  ;;  %v302_v26 = vld [vmem:[%s4209_s3 + $0x110] sm:$0xff]  ;;  %v303_v27 = vld [vmem:[%s4209_s3 + $0x118] sm:$0xff]  ;;  %v288_v28 = vld [vmem:[%s4209_s3 + $0xa0] sm:$0xff]  ;;  %v65_v29 = vrot.slane %v2575_v3, %v64_v18  ;;  %v72_v39 = vrot.slane %v2575_v3, %v71_v19 }
   0x7   :  { %2081 = vmatpush3.bf16.msra.mxu0 %v2080_v13  ;;  %v2116_v30 = vpack.c.bf16 %v303_v27, %v302_v26  ;;  %v289_v31 = vld [vmem:[%s4209_s3 + $0xa8] sm:$0xff]  ;;  %v320_v32 = vld [vmem:[%s4209_s3 + $0x1a0] sm:$0xff]  ;;  %v290_v41 = vld [vmem:[%s4209_s3 + $0xb0] sm:$0xff] }
   0x8   :  { %2113 = vmatpush3.bf16.msra.mxu1 %v2112_v14  ;;  %2083 = vmatprep.subr.bf16.mxu0 %v2082_v20  ;;  %v321_v33 = vld [vmem:[%s4209_s3 + $0x1a8] sm:$0xff]  ;;  %v2086_v34 = vpack.c.bf16 %v289_v31, %v288_v28  ;;  %v272_v36 = vld [vmem:[%s4209_s3 + $0x20] sm:$0xff]  ;;  %v291_v42 = vld [vmem:[%s4209_s3 + $0xb8] sm:$0xff] }
   0x9   :  { %2115 = vmatprep.subr.bf16.mxu1 %v2114_v24  ;;  %v2118_v35 = vpack.c.bf16 %v321_v33, %v320_v32  ;;  %v273_v37 = vld [vmem:[%s4209_s3 + $0x28] sm:$0xff]  ;;  %v304_v38 = vld [vmem:[%s4209_s3 + $0x120] sm:$0xff]  ;;  %67 = vbcast.lane.b32.xlu0 %v65_v29, 256  ;;  %v322_v45 = vld [vmem:[%s4209_s3 + $0x1b0] sm:$0xff]  ;;  %v2090_v48 = vpack.c.bf16 %v291_v42, %v290_v41 }
   0xa   :  { %v305_v40 = vld [vmem:[%s4209_s3 + $0x128] sm:$0xff]  ;;  %v2088_v43 = vpack.c.bf16 %v273_v37, %v272_v36  ;;  %v323_v46 = vld [vmem:[%s4209_s3 + $0x1b8] sm:$0xff]  ;;  %v274_v47 = vld [vmem:[%s4209_s3 + $0x30] sm:$0xff] }
   0xb   :  { %2085 = vmatpush3.bf16.msra.mxu0 %v2084_v25  ;;  %v2120_v44 = vpack.c.bf16 %v305_v40, %v304_v38  ;;  %v2122_v49 = vpack.c.bf16 %v323_v46, %v322_v45  ;;  %v275_v50 = vld [vmem:[%s4209_s3 + $0x38] sm:$0xff]  ;;  %v306_v51 = vld [vmem:[%s4209_s3 + $0x130] sm:$0xff]  ;;  %v292_v53 = vld [vmem:[%s4209_s3 + $0xc0] sm:$0xff] }
   0xc   :  { %2117 = vmatpush3.bf16.msra.mxu1 %v2116_v30  ;;  %2087 = vmatprep.subr.bf16.mxu0 %v2086_v34  ;;  %v307_v52 = vld [vmem:[%s4209_s3 + $0x138] sm:$0xff]  ;;  %v293_v54 = vld [vmem:[%s4209_s3 + $0xc8] sm:$0xff]  ;;  %v324_v55 = vld [vmem:[%s4209_s3 + $0x1c0] sm:$0xff]  ;;  %v2092_v57 = vpack.c.bf16 %v275_v50, %v274_v47 }
   0xd   :  { %2119 = vmatprep.subr.bf16.mxu1 %v2118_v35  ;;  %74 = vbcast.lane.b32.xlu0 %v72_v39, 256  ;;  %v325_v56 = vld [vmem:[%s4209_s3 + $0x1c8] sm:$0xff]  ;;  %v2124_v58 = vpack.c.bf16 %v307_v52, %v306_v51  ;;  %v276_v59 = vld [vmem:[%s4209_s3 + $0x40] sm:$0xff]  ;;  %v2094_v61 = vpack.c.bf16 %v293_v54, %v292_v53  ;;  %v294_v1 = vld [vmem:[%s4209_s3 + $0xd0] sm:$0xff] }
   0xe   :  { %v277_v60 = vld [vmem:[%s4209_s3 + $0x48] sm:$0xff]  ;;  %v2126_v62 = vpack.c.bf16 %v325_v56, %v324_v55  ;;  %v308_v63 = vld [vmem:[%s4209_s3 + $0x140] sm:$0xff]  ;;  %v295_v2 = vld [vmem:[%s4209_s3 + $0xd8] sm:$0xff] }
   0xf   :  { %2089 = vmatpush3.bf16.msra.mxu0 %v2088_v43  ;;  %v309_v0 = vld [vmem:[%s4209_s3 + $0x148] sm:$0xff]  ;;  %v326_v4 = vld [vmem:[%s4209_s3 + $0x1d0] sm:$0xff]  ;;  %v327_v5 = vld [vmem:[%s4209_s3 + $0x1d8] sm:$0xff]  ;;  %v2096_v6 = vpack.c.bf16 %v277_v60, %v276_v59  ;;  %v2098_v11 = vpack.c.bf16 %v295_v2, %v294_v1 }
  0x10   :  { %2121 = vmatpush3.bf16.msra.mxu1 %v2120_v44  ;;  %2091 = vmatprep.subr.bf16.mxu0 %v2090_v48  ;;  %v2128_v7 = vpack.c.bf16 %v309_v0, %v308_v63  ;;  %v278_v9 = vld [vmem:[%s4209_s3 + $0x50] sm:$0xff]  ;;  %v279_v10 = vld [vmem:[%s4209_s3 + $0x58] sm:$0xff]  ;;  %v2130_v12 = vpack.c.bf16 %v327_v5, %v326_v4  ;;  %v296_v15 = vld [vmem:[%s4209_s3 + $0xe0] sm:$0xff] }
  0x11   :  { %2123 = vmatprep.subr.bf16.mxu1 %v2122_v49  ;;  %v310_v13 = vld [vmem:[%s4209_s3 + $0x150] sm:$0xff]  ;;  %v311_v14 = vld [vmem:[%s4209_s3 + $0x158] sm:$0xff]  ;;  %v297_v16 = vld [vmem:[%s4209_s3 + $0xe8] sm:$0xff]  ;;  %v2100_v19 = vpack.c.bf16 %v279_v10, %v278_v9 }
  0x12   :  { %v328_v17 = vld [vmem:[%s4209_s3 + $0x1e0] sm:$0xff]  ;;  %v329_v18 = vld [vmem:[%s4209_s3 + $0x1e8] sm:$0xff]  ;;  %v2132_v20 = vpack.c.bf16 %v311_v14, %v310_v13  ;;  %v2102_v23 = vpack.c.bf16 %v297_v16, %v296_v15  ;;  %v298_v27 = vld [vmem:[%s4209_s3 + $0xf0] sm:$0xff] }
  0x13   :  { %2093 = vmatpush3.bf16.msra.mxu0 %v2092_v57  ;;  %v280_v21 = vld [vmem:[%s4209_s3 + $0x60] sm:$0xff]  ;;  %v281_v22 = vld [vmem:[%s4209_s3 + $0x68] sm:$0xff]  ;;  %v2134_v24 = vpack.c.bf16 %v329_v18, %v328_v17  ;;  %v299_v28 = vld [vmem:[%s4209_s3 + $0xf8] sm:$0xff] }
  0x14   :  { %2125 = vmatpush3.bf16.msra.mxu1 %v2124_v58  ;;  %2095 = vmatprep.subr.bf16.mxu0 %v2094_v61  ;;  %v312_v25 = vld [vmem:[%s4209_s3 + $0x160] sm:$0xff]  ;;  %v313_v26 = vld [vmem:[%s4209_s3 + $0x168] sm:$0xff]  ;;  %v330_v29 = vld [vmem:[%s4209_s3 + $0x1f0] sm:$0xff]  ;;  %v2104_v31 = vpack.c.bf16 %v281_v22, %v280_v21  ;;  %v2106_v35 = vpack.c.bf16 %v299_v28, %v298_v27 }
  0x15   :  { %2127 = vmatprep.subr.bf16.mxu1 %v2126_v62  ;;  %v331_v30 = vld [vmem:[%s4209_s3 + $0x1f8] sm:$0xff]  ;;  %v2136_v32 = vpack.c.bf16 %v313_v26, %v312_v25  ;;  %v282_v33 = vld [vmem:[%s4209_s3 + $0x70] sm:$0xff]  ;;  %v348_v39 = vld [vmem:[%s4209_s3 + $0x280] sm:$0xff] }
  0x16   :  { %v283_v34 = vld [vmem:[%s4209_s3 + $0x78] sm:$0xff]  ;;  %v2138_v36 = vpack.c.bf16 %v331_v30, %v330_v29  ;;  %v314_v37 = vld [vmem:[%s4209_s3 + $0x170] sm:$0xff]  ;;  %v349_v40 = vld [vmem:[%s4209_s3 + $0x288] sm:$0xff] }
  0x17   :  { %2097 = vmatpush3.bf16.msra.mxu0 %v2096_v6  ;;  %v315_v38 = vld [vmem:[%s4209_s3 + $0x178] sm:$0xff]  ;;  %v380_v41 = vld [vmem:[%s4209_s3 + $0x380] sm:$0xff]  ;;  %v381_v42 = vld [vmem:[%s4209_s3 + $0x388] sm:$0xff]  ;;  %v2108_v43 = vpack.c.bf16 %v283_v34, %v282_v33  ;;  %v2142_v45 = vpack.c.bf16 %v349_v40, %v348_v39 }
  0x18   :  { %2129 = vmatpush3.bf16.msra.mxu1 %v2128_v7  ;;  %2099 = vmatprep.subr.bf16.mxu0 %v2098_v11  ;;  %v2140_v44 = vpack.c.bf16 %v315_v38, %v314_v37  ;;  %v2174_v46 = vpack.c.bf16 %v381_v42, %v380_v41 }
  0x19   :  { %2131 = vmatprep.subr.bf16.mxu1 %v2130_v12 }
  0x1b   :  { %2101 = vmatpush3.bf16.msra.mxu0 %v2100_v19 }
  0x1c   :  { %2133 = vmatpush3.bf16.msra.mxu1 %v2132_v20  ;;  %2103 = vmatprep.subr.bf16.mxu0 %v2102_v23 }
  0x1d   :  { %2135 = vmatprep.subr.bf16.mxu1 %v2134_v24 }
  0x1f   :  { %2105 = vmatpush3.bf16.msra.mxu0 %v2104_v31 }
  0x20   :  { %2137 = vmatpush3.bf16.msra.mxu1 %v2136_v32  ;;  %2107 = vmatprep.subr.bf16.mxu0 %v2106_v35 }
  0x21   :  { %2139 = vmatprep.subr.bf16.mxu1 %v2138_v36 }
  0x23   :  { %2109 = vmatpush3.bf16.msra.mxu0 %v2108_v43 }
  0x24   :  { %2141 = vmatpush3.bf16.msra.mxu1 %v2140_v44  ;;  %2143 = vmatprep.subr.bf16.mxu0 %v2142_v45 }
  0x25   :  { %2175 = vmatprep.subr.bf16.mxu1 %v2174_v46 }
  0x26   :  { %15 = vsyncpa [#allocation5], 0  ;;  %v2784_v47 = vld [vmem:[%s4209_s3 + $0x200] sm:$0xff]  ;;  %v2789_v48 = vld [vmem:[%s4209_s3 + $0x208] sm:$0xff]  ;;  %vm484_vm0 = vcmask 1041409   ;;  %vm31_vm1 = vcmask 58368  }
  0x27   :  { %v2794_v49 = vld [vmem:[%s4209_s3 + $0x300] sm:$0xff]  ;;  %v2799_v50 = vld [vmem:[%s4209_s3 + $0x308] sm:$0xff]  ;;  %v2804_v51 = vld [vmem:[%s4209_s3 + $0x290] sm:$0xff] }
  0x28   :  { %v2809_v52 = vld [vmem:[%s4209_s3 + $0x298] sm:$0xff]  ;;  %v2814_v53 = vld [vmem:[%s4209_s3 + $0x390] sm:$0xff]  ;;  %v39_v59 = vld [vmem:[%s4206_s0 + $0x8] sm:$0xff] }
  0x29   :  { %v2819_v54 = vld [vmem:[%s4209_s3 + $0x398] sm:$0xff]  ;;  %v2824_v55 = vld [vmem:[%s4209_s3 + $0x210] sm:$0xff]  ;;  %v38_v61 = vld [vmem:[%s4206_s0] sm:$0xff] }
  0x2a   :  { %v2829_v56 = vld [vmem:[%s4209_s3 + $0x218] sm:$0xff]  ;;  %v2834_v57 = vld [vmem:[%s4209_s3 + $0x310] sm:$0xff]  ;;  %v2856_v63 = vld [vmem:[%s4209_s3 + $0x2a0] sm:$0xff] }
  0x2b   :  { %v2839_v58 = vld [vmem:[%s4209_s3 + $0x318] sm:$0xff]  ;;  %v40_v62 = vld [vmem:[%s4206_s0 + $0x10] sm:$0xff]  ;;  %v2861_v0 = vld [vmem:[%s4209_s3 + $0x2a8] sm:$0xff] }
  0x2c   :  { %v41_v60 = vld [vmem:[%s4206_s0 + $0x18] sm:$0xff]  ;;  %v2866_v1 = vld [vmem:[%s4209_s3 + $0x3a0] sm:$0xff]  ;;  %v2871_v2 = vld [vmem:[%s4209_s3 + $0x3a8] sm:$0xff] }
  0x2d   :  { %v2876_v4 = vld [vmem:[%s4209_s3 + $0x220] sm:$0xff]  ;;  %v2881_v5 = vld [vmem:[%s4209_s3 + $0x228] sm:$0xff]  ;;  %v45_v9 = vld [vmem:[%s4206_s0 + $0x38] sm:$0xff] }
  0x2e   :  { %v43_v7 = vld [vmem:[%s4206_s0 + $0x28] sm:$0xff]  ;;  %v2894_v10 = vld [vmem:[%s4209_s3 + $0x320] sm:$0xff]  ;;  %v2912_v16 = vld [vmem:[%s4209_s3 + $0x2b0] sm:$0xff] }
  0x2f   :  { %v2907_v15 = vld [vmem:[%s4209_s3 + $0x328] sm:$0xff]  ;;  %v2917_v17 = vld [vmem:[%s4209_s3 + $0x2b8] sm:$0xff]  ;;  %v2932_v23 = vld [vmem:[%s4209_s3 + $0x3b0] sm:$0xff] }
  0x30   :  { %v2941_v28 = vld [vmem:[%s4209_s3 + $0x3b8] sm:$0xff]  ;;  %v2946_v29 = vld [vmem:[%s4209_s3 + $0x230] sm:$0xff]  ;;  %v51_v31 = vld [vmem:[%s4206_s0 + $0x68] sm:$0xff] }
  0x31   :  { %4219 = vst [vmem:[#allocation9_spill] sm:$0xff] %v2946_v29  ;;  %v2951_v30 = vld [vmem:[%s4209_s3 + $0x238] sm:$0xff]  ;;  %v50_v39 = vld [vmem:[%s4206_s0 + $0x60] sm:$0xff]  ;;  %v52_v41 = vld [vmem:[%s4206_s0 + $0x70] sm:$0xff] }
  0x32   :  { %4220 = vst [vmem:[#allocation10_spill] sm:$0xff] %v2951_v30  ;;  %v53_v32 = vld [vmem:[%s4206_s0 + $0x78] sm:$0xff]  ;;  %v55_v30 = vld [vmem:[%s4206_s0 + $0x88] sm:$0xff] }
  0x7b   :  { %v2919_v18 = vpop.permute.xlu0 %67 }
  0x7c   :  { %v77_v24 = vmul.f32 %v2919_v18, %v39_v59  ;;  %v79_v25 = vmul.f32 %v2919_v18, %v41_v60  ;;  %v76_v26 = vmul.f32 %v2919_v18, %v38_v61  ;;  %v78_v27 = vmul.f32 %v2919_v18, %v40_v62 }
  0x7d   :  { %v81_v33 = vmul.f32 %v2919_v18, %v43_v7  ;;  %v2961_v34 = vmul.f32 %v2919_v18, %v45_v9 }
  0x7e   :  { %v106_v37 = vrot.slane %v77_v24, 4  ;;  %v118_v38 = vrot.slane %v79_v25, 4  ;;  %v100_v40 = vrot.slane %v76_v26, 4  ;;  %v112_v42 = vrot.slane %v78_v27, 4 }
  0x7f   :  { %v2973_v43 = vpop.permute.xlu0 %74  ;;  %v130_v44 = vrot.slane %v81_v33, 4  ;;  %v142_v45 = vrot.slane %v2961_v34, 4 }
  0x80   :  { %v89_v60 = vmul.f32 %v2973_v43, %v51_v31  ;;  %v107_v61 = vadd.f32 %v106_v37, %v77_v24  ;;  %v91_v62 = vmul.f32 %v2973_v43, %v53_v32  ;;  %v119_v7 = vadd.f32 %v118_v38, %v79_v25 }
  0x81   :  { %v88_v9 = vmul.f32 %v2973_v43, %v50_v39  ;;  %v101_v36 = vadd.f32 %v100_v40, %v76_v26  ;;  %v90_v35 = vmul.f32 %v2973_v43, %v52_v41  ;;  %v113_v22 = vadd.f32 %v112_v42, %v78_v27 }
  0x82   :  { %v108_v21 = vrot.slane %v107_v61, 2  ;;  %v178_v20 = vrot.slane %v89_v60, 4  ;;  %v120_v19 = vrot.slane %v119_v7, 2  ;;  %v190_v14 = vrot.slane %v91_v62, 4 }
  0x83   :  { %v102_v46 = vrot.slane %v101_v36, 2  ;;  %v172_v13 = vrot.slane %v88_v9, 4  ;;  %v114_v59 = vrot.slane %v113_v22, 2  ;;  %v184_v12 = vrot.slane %v90_v35, 4 }
  0x84   :  { %v109_v31 = vadd.f32 %v108_v21, %v107_v61  ;;  %v179_v24 = vadd.f32 %v178_v20, %v89_v60  ;;  %v121_v37 = vadd.f32 %v120_v19, %v119_v7  ;;  %v191_v32 = vadd.f32 %v190_v14, %v91_v62 }
  0x85   :  { %v103_v25 = vadd.f32 %v102_v46, %v101_v36  ;;  %v173_v38 = vadd.f32 %v172_v13, %v88_v9  ;;  %v115_v39 = vadd.f32 %v114_v59, %v113_v22  ;;  %v185_v26 = vadd.f32 %v184_v12, %v90_v35  ;;  %v57_v12 = vld [vmem:[%s4206_s0 + $0x98] sm:$0xff] }
  0x86   :  { %v110_v40 = vrot.slane %v109_v31, 1  ;;  %v180_v41 = vrot.slane %v179_v24, 2  ;;  %v122_v27 = vrot.slane %v121_v37, 1  ;;  %v192_v42 = vrot.slane %v191_v32, 2 }
  0x87   :  { %v104_v11 = vrot.slane %v103_v25, 1  ;;  %v174_v6 = vrot.slane %v173_v38, 2  ;;  %v116_v8 = vrot.slane %v115_v39, 1  ;;  %v186_v29 = vrot.slane %v185_v26, 2 }
  0x88   :  { %v111_v21 = vadd.f32 %v110_v40, %v109_v31  ;;  %v181_v20 = vadd.f32 %v180_v41, %v179_v24  ;;  %v123_v19 = vadd.f32 %v122_v27, %v121_v37  ;;  %v193_v14 = vadd.f32 %v192_v42, %v191_v32  ;;  %v2996_v24 = vld [vmem:[%s4209_s3 + $0x330] sm:$0xff]  ;;  %v3036_v40 = vld [vmem:[%s4209_s3 + $0x340] sm:$0xff]  ;;  %v3041_v41 = vld [vmem:[%s4209_s3 + $0x348] sm:$0xff] }
  0x89   :  { %v105_v13 = vadd.f32 %v104_v11, %v103_v25  ;;  %v175_v22 = vadd.f32 %v174_v6, %v173_v38  ;;  %v117_v35 = vadd.f32 %v116_v8, %v115_v39  ;;  %v187_v36 = vadd.f32 %v186_v29, %v185_v26  ;;  %v3001_v8 = vld [vmem:[%s4209_s3 + $0x338] sm:$0xff]  ;;  %v3006_v6 = vld [vmem:[%s4209_s3 + $0x2c0] sm:$0xff]  ;;  %v3031_v26 = vld [vmem:[%s4209_s3 + $0x248] sm:$0xff] }
  0x8a   :  { %v182_v46 = vrot.slane %v181_v20, 1  ;;  %v194_v59 = vrot.slane %v193_v14, 1  ;;  %v93_v60 = vmul.f32 %v2973_v43, %v55_v30  ;;  %v131_v61 = vadd.f32 %v130_v44, %v81_v33  ;;  %v3016_v44 = vld [vmem:[%s4209_s3 + $0x3c0] sm:$0xff] }
  0x8b   :  { %v176_v62 = vrot.slane %v175_v22, 1  ;;  %v188_v7 = vrot.slane %v187_v36, 1  ;;  %v95_v9 = vmul.f32 %v2973_v43, %v57_v12  ;;  %v143_v31 = vadd.f32 %v142_v45, %v2961_v34  ;;  %v3011_v34 = vld [vmem:[%s4209_s3 + $0x2c8] sm:$0xff]  ;;  %v3026_v39 = vld [vmem:[%s4209_s3 + $0x240] sm:$0xff]  ;;  %v3048_v12 = vld [vmem:[%s4209_s3 + $0x2d0] sm:$0xff] }
  0x8c   :  { %v183_v11 = vadd.f32 %v182_v46, %v181_v20  ;;  %v195_v29 = vadd.f32 %v194_v59, %v193_v14  ;;  %v132_v30 = vrot.slane %v131_v61, 2  ;;  %v202_v33 = vrot.slane %v93_v60, 4  ;;  %v3021_v45 = vld [vmem:[%s4209_s3 + $0x3c8] sm:$0xff]  ;;  %v3063_v59 = vld [vmem:[%s4209_s3 + $0x2d8] sm:$0xff] }
  0x8d   :  { %v177_v37 = vadd.f32 %v176_v62, %v175_v22  ;;  %v189_v32 = vadd.f32 %v188_v7, %v187_v36  ;;  %v144_v25 = vrot.slane %v143_v31, 2  ;;  %v214_v38 = vrot.slane %v95_v9, 4  ;;  %v54_v22 = vld [vmem:[%s4206_s0 + $0x80] sm:$0xff]  ;;  %v56_v36 = vld [vmem:[%s4206_s0 + $0x90] sm:$0xff] }
  0x8e   :  { %v486_v27 = vsel %vm484_vm0, %v183_v11, %v111_v21  ;;  %v488_v42 = vsel %vm484_vm0, %v195_v29, %v123_v19  ;;  %v133_v20 = vadd.f32 %v132_v30, %v131_v61  ;;  %v203_v14 = vadd.f32 %v202_v33, %v93_v60  ;;  %v3068_v60 = vld [vmem:[%s4209_s3 + $0x3d0] sm:$0xff]  ;;  %v3073_v61 = vld [vmem:[%s4209_s3 + $0x3d8] sm:$0xff]  ;;  %v42_v30 = vld [vmem:[%s4206_s0 + $0x20] sm:$0xff] }
  0x8f   :  { %573 = vmatprep.mubr.f32.mxu0 %v486_v27  ;;  %643 = vmatprep.mubr.f32.mxu1 %v488_v42  ;;  %v485_v21 = vsel %vm484_vm0, %v177_v37, %v105_v13  ;;  %v487_v19 = vsel %vm484_vm0, %v189_v32, %v117_v35  ;;  %v2188_v46 = vpack.c.bf16 %v3001_v8, %v2996_v24  ;;  %v3080_v11 = vld [vmem:[%s4209_s3 + $0x250] sm:$0xff]  ;;  %v3085_v29 = vld [vmem:[%s4209_s3 + $0x258] sm:$0xff] }
  0x90   :  { %574 = vmatmul.mubr.f32.vlgmr.msra.gmra.mrb[0].mxu0 %v485_v21  ;;  %644 = vmatmul.mubr.f32.vlgmr.msra.gmra.mrb[0].mxu1 %v487_v19  ;;  %v204_v13 = vrot.slane %v203_v14, 2  ;;  %v145_v35 = vadd.f32 %v144_v25, %v143_v31  ;;  %v215_v62 = vadd.f32 %v214_v38, %v95_v9  ;;  %v2158_v7 = vpack.c.bf16 %v3011_v34, %v3006_v6  ;;  %v44_v25 = vld [vmem:[%s4206_s0 + $0x30] sm:$0xff]  ;;  %v59_v19 = vld [vmem:[%s4206_s0 + $0xa8] sm:$0xff] }
  0x91   :  { %v4221_v9 = vpack.c.bf16 %v2789_v48, %v2784_v47  ;;  %v4222_v31 = vpack.c.bf16 %v2799_v50, %v2794_v49  ;;  %v134_v33 = vrot.slane %v133_v20, 1  ;;  %v3099_v32 = vmul.f32 %v2973_v43, %v54_v22  ;;  %v3120_v22 = vld [vmem:[%s4209_s3 + $0x350] sm:$0xff] }
  0x92   :  { %v3105_v38 = vmul.f32 %v2973_v43, %v56_v36  ;;  %v205_v47 = vadd.f32 %v204_v13, %v203_v14  ;;  %v216_v48 = vrot.slane %v215_v62, 2  ;;  %v4223_v49 = vpack.c.bf16 %v2809_v52, %v2804_v51  ;;  %v3125_v51 = vld [vmem:[%s4209_s3 + $0x358] sm:$0xff]  ;;  %v3136_v14 = vld [vmem:[%s4209_s3 + $0x2e0] sm:$0xff]  ;;  %v3141_v36 = vld [vmem:[%s4209_s3 + $0x2e8] sm:$0xff] }
  0x93   :  { %2145 = vmatpush3.bf16.msra.mxu0 %v4221_v9  ;;  %2177 = vmatpush3.bf16.msra.mxu1 %v4222_v31  ;;  %v4224_v50 = vpack.c.bf16 %v2819_v54, %v2814_v53  ;;  %v80_v21 = vmul.f32 %v2919_v18, %v42_v30  ;;  %v146_v9 = vrot.slane %v145_v35, 1  ;;  %v82_v54 = vmul.f32 %v2919_v18, %v44_v25  ;;  %v47_v30 = vld [vmem:[%s4206_s0 + $0x48] sm:$0xff]  ;;  %v3172_v25 = vld [vmem:[%s4209_s3 + $0x260] sm:$0xff]  ;;  %v49_v52 = vld [vmem:[%s4206_s0 + $0x58] sm:$0xff] }
  0x94   :  { %2147 = vmatprep.subr.bf16.mxu0 %v4223_v49  ;;  %v206_v13 = vrot.slane %v205_v47, 1  ;;  %v217_v31 = vadd.f32 %v216_v48, %v215_v62  ;;  %v3150_v49 = vld [vmem:[%s4209_s3 + $0x3e0] sm:$0xff]  ;;  %v135_v53 = vadd.f32 %v134_v33, %v133_v20  ;;  %v4225_v62 = vpack.c.bf16 %v2829_v56, %v2824_v55 }
  0x95   :  { %2179 = vmatprep.subr.bf16.mxu1 %v4224_v50  ;;  %v3155_v50 = vld [vmem:[%s4209_s3 + $0x3e8] sm:$0xff]  ;;  %v4226_v48 = vpack.c.bf16 %v2839_v58, %v2834_v57  ;;  %v196_v42 = vrot.slane %v3099_v32, 4  ;;  %v208_v20 = vrot.slane %v3105_v38, 4  ;;  %v4227_v55 = vpack.c.bf16 %v2861_v0, %v2856_v63  ;;  %v3190_v58 = vld [vmem:[%s4209_s3 + $0x360] sm:$0xff] }
  0x96   :  { %v207_v33 = vadd.f32 %v206_v13, %v205_v47  ;;  %v218_v27 = vrot.slane %v217_v31, 1  ;;  %v4228_v56 = vpack.c.bf16 %v2871_v2, %v2866_v1  ;;  %v3185_v57 = vld [vmem:[%s4209_s3 + $0x268] sm:$0xff]  ;;  %v97_v63 = vmul.f32 %v2973_v43, %v59_v19  ;;  %v61_v19 = vld [vmem:[%s4206_s0 + $0xb8] sm:$0xff]  ;;  %v46_v1 = vld [vmem:[%s4206_s0 + $0x40] sm:$0xff] }
  0x97   :  { %2149 = vmatpush3.bf16.msra.mxu0 %v4225_v62  ;;  %2181 = vmatpush3.bf16.msra.mxu1 %v4226_v48  ;;  %v3195_v47 = vld [vmem:[%s4209_s3 + $0x368] sm:$0xff]  ;;  %v124_v2 = vrot.slane %v80_v21, 4  ;;  %v85_v13 = vmul.f32 %v2919_v18, %v47_v30  ;;  %v147_v48 = vadd.f32 %v146_v9, %v145_v35  ;;  %v4229_v30 = vpack.c.bf16 %v2881_v5, %v2876_v4  ;;  %v3228_v9 = vld [vmem:[%s4209_s3 + $0x2f8] sm:$0xff]  ;;  %v58_v4 = vld [vmem:[%s4206_s0 + $0xa0] sm:$0xff] }
  0x98   :  { %2151 = vmatprep.subr.bf16.mxu0 %v4227_v55  ;;  %2183 = vmatprep.subr.bf16.mxu1 %v4228_v56  ;;  %v490_v62 = vsel %vm484_vm0, %v207_v33, %v135_v53  ;;  %v219_v55 = vadd.f32 %v218_v27, %v217_v31  ;;  %v136_v56 = vrot.slane %v82_v54, 4  ;;  %v3223_v53 = vld [vmem:[%s4209_s3 + $0x2f0] sm:$0xff]  ;;  %v226_v31 = vrot.slane %v97_v63, 4 }
  0x99   :  { %713 = vmatprep.mubr.f32.mxu0 %v490_v62  ;;  %v32_v5 = vsel %vm31_vm1, %v2575_v3, 0.0  ;;  %v4230_v62 = vpack.c.bf16 %v2907_v15, %v2894_v10  ;;  %v3245_v27 = vld [vmem:[%s4209_s3 + $0x3f0] sm:$0xff]  ;;  %v197_v35 = vadd.f32 %v196_v42, %v3099_v32  ;;  %v209_v0 = vadd.f32 %v208_v20, %v3105_v38  ;;  %v3255_v10 = vld [vmem:[%s4209_s3 + $0x3f8] sm:$0xff] }
  0x9a   :  { %v492_v33 = vsel %vm484_vm0, %v219_v55, %v147_v48  ;;  %v4232_v3 = vpack.c.bf16 %v2941_v28, %v2932_v23  ;;  %v3260_v15 = vld [vmem:[%s4209_s3 + $0x270] sm:$0xff]  ;;  %v87_v32 = vmul.f32 %v2919_v18, %v49_v52  ;;  %v99_v23 = vmul.f32 %v2973_v43, %v61_v19  ;;  %33 = vadd.xlane.f32.xlu1 %v32_v5 }
  0x9b   :  { %2153 = vmatpush3.bf16.msra.mxu0 %v4229_v30  ;;  %2185 = vmatpush3.bf16.msra.mxu1 %v4230_v62  ;;  %v4231_v30 = vpack.c.bf16 %v2917_v17, %v2912_v16  ;;  %v3265_v16 = vld [vmem:[%s4209_s3 + $0x278] sm:$0xff]  ;;  %v154_v17 = vrot.slane %v85_v13, 4  ;;  %v84_v28 = vmul.f32 %v2919_v18, %v46_v1  ;;  %v2170_v38 = vpack.c.bf16 %v3228_v9, %v3223_v53  ;;  %v48_v1 = vld [vmem:[%s4206_s0 + $0x50] sm:$0xff] }
  0x9c   :  { %783 = vmatprep.mubr.f32.mxu1 %v492_v33  ;;  %2187 = vmatprep.subr.bf16.mxu1 %v4232_v3  ;;  %v125_v42 = vadd.f32 %v124_v2, %v80_v21  ;;  %v137_v20 = vadd.f32 %v136_v56, %v82_v54  ;;  %v96_v48 = vmul.f32 %v2973_v43, %v58_v4  ;;  %v4233_v55 = vld [vmem:[#allocation10_spill] sm:$0xff]  ;;  %v4234_v33 = vld [vmem:[#allocation9_spill] sm:$0xff]  ;;  %v166_v3 = vrot.slane %v87_v32, 4 }
  0x9d   :  { %2155 = vmatprep.subr.bf16.mxu0 %v4231_v30  ;;  %v4235_v62 = vpack.c.bf16 %v4233_v55, %v4234_v33  ;;  %v227_v30 = vadd.f32 %v226_v31, %v97_v63  ;;  %v238_v37 = vrot.slane %v99_v23, 4  ;;  %v148_v52 = vrot.slane %v84_v28, 4  ;;  %v60_v56 = vld [vmem:[%s4206_s0 + $0xb0] sm:$0xff] }
  0x9e   :  { %v2202_v54 = vpack.c.bf16 %v3255_v10, %v3245_v27  ;;  %v2172_v21 = vpack.c.bf16 %v3265_v16, %v3260_v15  ;;  %v198_v63 = vrot.slane %v197_v35, 2  ;;  %v220_v2 = vrot.slane %v96_v48, 4  ;;  %v3302_v55 = vld [vmem:[%s4209_s3 + $0x370] sm:$0xff]  ;;  %v415_v10 = vld [vmem:[%s4209_s3 + $0x498] sm:$0xff] }
  0x9f   :  { %2157 = vmatpush3.bf16.msra.mxu0 %v4235_v62  ;;  %2189 = vmatpush3.bf16.msra.mxu1 %v2188_v46  ;;  %v4236_v24 = vpack.c.bf16 %v3021_v45, %v3016_v44  ;;  %v210_v8 = vrot.slane %v209_v0, 2  ;;  %v155_v46 = vadd.f32 %v154_v17, %v85_v13  ;;  %v239_v6 = vadd.f32 %v238_v37, %v99_v23  ;;  %v3307_v44 = vld [vmem:[%s4209_s3 + $0x378] sm:$0xff]  ;;  %v414_v27 = vld [vmem:[%s4209_s3 + $0x490] sm:$0xff] }
  0xa0   :  { %2159 = vmatprep.subr.bf16.mxu0 %v2158_v7  ;;  %v149_v34 = vadd.f32 %v148_v52, %v84_v28  ;;  %v126_v7 = vrot.slane %v125_v42, 2  ;;  %v167_v19 = vadd.f32 %v166_v3, %v87_v32  ;;  %v221_v31 = vadd.f32 %v220_v2, %v96_v48  ;;  %v398_v15 = vld [vmem:[%s4209_s3 + $0x410] sm:$0xff]  ;;  %v399_v16 = vld [vmem:[%s4209_s3 + $0x418] sm:$0xff] }
  0xa1   :  { %2191 = vmatprep.subr.bf16.mxu1 %v4236_v24  ;;  %v86_v4 = vmul.f32 %v2919_v18, %v48_v1  ;;  %v4237_v5 = vpack.c.bf16 %v3031_v26, %v3026_v39  ;;  %v138_v45 = vrot.slane %v137_v20, 2  ;;  %v228_v37 = vrot.slane %v227_v30, 2 }
  0xa2   :  { %v150_v13 = vrot.slane %v149_v34, 2  ;;  %v98_v17 = vmul.f32 %v2973_v43, %v60_v56  ;;  %v4238_v18 = vpack.c.bf16 %v3041_v41, %v3036_v40  ;;  %v4239_v39 = vpack.c.bf16 %v3063_v59, %v3048_v12  ;;  %v412_v56 = vld [vmem:[%s4209_s3 + $0x480] sm:$0xff] }
  0xa3   :  { %2161 = vmatpush3.bf16.msra.mxu0 %v4237_v5  ;;  %v199_v26 = vadd.f32 %v198_v63, %v197_v35  ;;  %v240_v32 = vrot.slane %v239_v6, 2  ;;  %v222_v23 = vrot.slane %v221_v31, 2  ;;  %v160_v28 = vrot.slane %v86_v4, 4  ;;  %v397_v5 = vld [vmem:[%s4209_s3 + $0x408] sm:$0xff] }
  0xa4   :  { %2193 = vmatpush3.bf16.msra.mxu1 %v4238_v18  ;;  %2163 = vmatprep.subr.bf16.mxu0 %v4239_v39  ;;  %v4240_v48 = vpack.c.bf16 %v3073_v61, %v3068_v60  ;;  %v211_v33 = vadd.f32 %v210_v8, %v209_v0  ;;  %v156_v62 = vrot.slane %v155_v46, 2  ;;  %v151_v3 = vadd.f32 %v150_v13, %v149_v34  ;;  %v445_v8 = vld [vmem:[%s4209_s3 + $0x588] sm:$0xff] }
  0xa5   :  { %v232_v43 = vrot.slane %v98_v17, 4  ;;  %v2204_v40 = vpack.c.bf16 %v3307_v44, %v3302_v55  ;;  %v168_v41 = vrot.slane %v167_v19, 2  ;;  %v223_v52 = vadd.f32 %v222_v23, %v221_v31  ;;  %v447_v23 = vld [vmem:[%s4209_s3 + $0x598] sm:$0xff] }
  0xa6   :  { %2195 = vmatprep.subr.bf16.mxu1 %v4240_v48  ;;  %v161_v1 = vadd.f32 %v160_v28, %v86_v4  ;;  %v4241_v12 = vpack.c.bf16 %v3085_v29, %v3080_v11  ;;  %v127_v59 = vadd.f32 %v126_v7, %v125_v42  ;;  %v229_v35 = vadd.f32 %v228_v37, %v227_v30  ;;  %v413_v11 = vld [vmem:[%s4209_s3 + $0x488] sm:$0xff] }
  0xa7   :  { %v152_v63 = vrot.slane %v151_v3, 1  ;;  %v233_v2 = vadd.f32 %v232_v43, %v98_v17  ;;  %v4242_v60 = vpack.c.bf16 %v3125_v51, %v3120_v22  ;;  %v4243_v61 = vpack.c.bf16 %v3141_v36, %v3136_v14 }
  0xa8   :  { %2165 = vmatpush3.bf16.msra.mxu0 %v4241_v12  ;;  %v139_v0 = vadd.f32 %v138_v45, %v137_v20  ;;  %v241_v29 = vadd.f32 %v240_v32, %v239_v6  ;;  %v224_v42 = vrot.slane %v223_v52, 1  ;;  %v162_v30 = vrot.slane %v161_v1, 2  ;;  %v444_v20 = vld [vmem:[%s4209_s3 + $0x580] sm:$0xff]  ;;  %v446_v32 = vld [vmem:[%s4209_s3 + $0x590] sm:$0xff]  ;;  %v417_v12 = vld [vmem:[%s4209_s3 + $0x4a8] sm:$0xff] }
  0xa9   :  { %2197 = vmatpush3.bf16.msra.mxu1 %v4242_v60  ;;  %2167 = vmatprep.subr.bf16.mxu0 %v4243_v61  ;;  %v4244_v22 = vpack.c.bf16 %v3155_v50, %v3150_v49  ;;  %v200_v51 = vrot.slane %v199_v26, 1  ;;  %v212_v24 = vrot.slane %v211_v33, 1  ;;  %v157_v14 = vadd.f32 %v156_v62, %v155_v46  ;;  %v396_v46 = vld [vmem:[%s4209_s3 + $0x400] sm:$0xff]  ;;  %v449_v61 = vld [vmem:[%s4209_s3 + $0x5a8] sm:$0xff] }
  0xaa   :  { %v234_v36 = vrot.slane %v233_v2, 2  ;;  %v169_v34 = vadd.f32 %v168_v41, %v167_v19  ;;  %v153_v6 = vadd.f32 %v152_v63, %v151_v3  ;;  %v225_v7 = vadd.f32 %v224_v42, %v223_v52  ;;  %v431_v52 = vld [vmem:[%s4209_s3 + $0x518] sm:$0xff]  ;;  %v448_v60 = vld [vmem:[%s4209_s3 + $0x5a0] sm:$0xff] }
  0xab   :  { %2199 = vmatprep.subr.bf16.mxu1 %v4244_v22  ;;  %v163_v31 = vadd.f32 %v162_v30, %v161_v1  ;;  %v4245_v49 = vpack.c.bf16 %v3185_v57, %v3172_v25  ;;  %v128_v50 = vrot.slane %v127_v59, 1  ;;  %v2206_v4 = vpack.c.bf16 %v413_v11, %v412_v56  ;;  %v416_v1 = vld [vmem:[%s4209_s3 + $0x4a0] sm:$0xff]  ;;  %v401_v22 = vld [vmem:[%s4209_s3 + $0x428] sm:$0xff] }
  0xac   :  { %v230_v55 = vrot.slane %v229_v35, 1  ;;  %v235_v44 = vadd.f32 %v234_v36, %v233_v2  ;;  %v4246_v19 = vpack.c.bf16 %v3195_v47, %v3190_v58  ;;  %v140_v25 = vrot.slane %v139_v0, 1  ;;  %v428_v58 = vld [vmem:[%s4209_s3 + $0x500] sm:$0xff]  ;;  %v429_v47 = vld [vmem:[%s4209_s3 + $0x508] sm:$0xff]  ;;  %v418_v36 = vld [vmem:[%s4209_s3 + $0x4b0] sm:$0xff] }
  0xad   :  { %2169 = vmatpush3.bf16.msra.mxu0 %v4245_v49  ;;  %v242_v57 = vrot.slane %v241_v29, 1  ;;  %v3361_v45 = vsel %vm484_vm0, %v225_v7, %v153_v6  ;;  %v164_v37 = vrot.slane %v163_v31, 1  ;;  %v201_v13 = vadd.f32 %v200_v51, %v199_v26  ;;  %v400_v30 = vld [vmem:[%s4209_s3 + $0x420] sm:$0xff]  ;;  %v402_v49 = vld [vmem:[%s4209_s3 + $0x430] sm:$0xff] }
  0xae   :  { %2201 = vmatpush3.bf16.msra.mxu1 %v4246_v19  ;;  %2171 = vmatprep.subr.bf16.mxu0 %v2170_v38  ;;  %v2238_v17 = vpack.c.bf16 %v445_v8, %v444_v20  ;;  %v158_v18 = vrot.slane %v157_v14, 1  ;;  %v236_v53 = vrot.slane %v235_v44, 1  ;;  %v213_v9 = vadd.f32 %v212_v24, %v211_v33  ;;  %v432_v51 = vld [vmem:[%s4209_s3 + $0x520] sm:$0xff]  ;;  %v419_v20 = vld [vmem:[%s4209_s3 + $0x4b8] sm:$0xff]  ;;  %v450_v8 = vld [vmem:[%s4209_s3 + $0x5b0] sm:$0xff] }
  0xaf   :  { %2203 = vmatprep.subr.bf16.mxu1 %v2202_v54  ;;  %v2208_v38 = vpack.c.bf16 %v397_v5, %v396_v46  ;;  %v170_v39 = vrot.slane %v169_v34, 1  ;;  %v129_v54 = vadd.f32 %v128_v50, %v127_v59  ;;  %v231_v26 = vadd.f32 %v230_v55, %v229_v35  ;;  %v403_v50 = vld [vmem:[%s4209_s3 + $0x438] sm:$0xff]  ;;  %v420_v55 = vld [vmem:[%s4209_s3 + $0x4c0] sm:$0xff] }
  0xb0   :  { %v165_v28 = vadd.f32 %v164_v37, %v163_v31  ;;  %v237_v48 = vadd.f32 %v236_v53, %v235_v44  ;;  %v141_v33 = vadd.f32 %v140_v25, %v139_v0  ;;  %v2240_v62 = vpack.c.bf16 %v429_v47, %v428_v58  ;;  %v435_v5 = vld [vmem:[%s4209_s3 + $0x538] sm:$0xff]  ;;  %v421_v44 = vld [vmem:[%s4209_s3 + $0x4c8] sm:$0xff]  ;;  %v452_v19 = vld [vmem:[%s4209_s3 + $0x5c0] sm:$0xff] }
  0xb1   :  { %2173 = vmatpush3.bf16.msra.mxu0 %v2172_v21  ;;  %v243_v3 = vadd.f32 %v242_v57, %v241_v29  ;;  %v430_v21 = vld [vmem:[%s4209_s3 + $0x510] sm:$0xff]  ;;  %v489_v43 = vsel %vm484_vm0, %v201_v13, %v129_v54  ;;  %v2210_v41 = vpack.c.bf16 %v415_v10, %v414_v27  ;;  %v171_v63 = vadd.f32 %v170_v39, %v169_v34  ;;  %v451_v34 = vld [vmem:[%s4209_s3 + $0x5b8] sm:$0xff]  ;;  %v453_v25 = vld [vmem:[%s4209_s3 + $0x5c8] sm:$0xff] }
  0xb2   :  { %2205 = vmatpush3.bf16.msra.mxu1 %v2204_v40  ;;  %2207 = vmatprep.subr.bf16.mxu0 %v2206_v4  ;;  %v159_v40 = vadd.f32 %v158_v18, %v157_v14  ;;  %v3407_v59 = vsel %vm484_vm0, %v237_v48, %v165_v28  ;;  %v491_v35 = vsel %vm484_vm0, %v213_v9, %v141_v33  ;;  %v433_v14 = vld [vmem:[%s4209_s3 + $0x528] sm:$0xff]  ;;  %v434_v4 = vld [vmem:[%s4209_s3 + $0x530] sm:$0xff]  ;;  %v436_v58 = vld [vmem:[%s4209_s3 + $0x540] sm:$0xff]  ;;  %v2518_v48 = vmov 1983009808  }
  0xb3   :  { %2239 = vmatprep.subr.bf16.mxu1 %v2238_v17  ;;  %v2242_v2 = vpack.c.bf16 %v447_v23, %v446_v32  ;;  %v2212_v56 = vpack.c.bf16 %v399_v16, %v398_v15  ;;  %v496_v11 = vsel %vm484_vm0, %v243_v3, %v171_v63  ;;  %v2244_v29 = vpack.c.bf16 %v431_v52, %v430_v21  ;;  %v404_v17 = vld [vmem:[%s4209_s3 + $0x440] sm:$0xff]  ;;  %v405_v18 = vld [vmem:[%s4209_s3 + $0x448] sm:$0xff]  ;;  %v422_v9 = vld [vmem:[%s4209_s3 + $0x4d0] sm:$0xff] }
  0xb4   :  { %714 = vmatmul.mubr.f32.vlgmr.msra.gmra.mrb[2].mxu0 %v489_v43  ;;  %v494_v0 = vsel %vm484_vm0, %v231_v26, %v159_v40  ;;  %v2214_v42 = vpack.c.bf16 %v417_v12, %v416_v1  ;;  %v2246_v24 = vpack.c.bf16 %v449_v61, %v448_v60  ;;  %v2216_v6 = vpack.c.bf16 %v401_v22, %v400_v30  ;;  %v437_v53 = vld [vmem:[%s4209_s3 + $0x548] sm:$0xff]  ;;  %v454_v39 = vld [vmem:[%s4209_s3 + $0x5d0] sm:$0xff]  ;;  %v455_v27 = vld [vmem:[%s4209_s3 + $0x5d8] sm:$0xff] }
  0xb5   :  { %784 = vmatmul.mubr.f32.vlgmr.msra.gmra.mrb[2].mxu1 %v491_v35  ;;  %2209 = vmatpush3.bf16.msra.mxu0 %v2208_v38  ;;  %v2248_v7 = vpack.c.bf16 %v433_v14, %v432_v51  ;;  %v2218_v31 = vpack.c.bf16 %v419_v20, %v418_v36  ;;  %v2250_v46 = vpack.c.bf16 %v451_v34, %v450_v8  ;;  %v423_v38 = vld [vmem:[%s4209_s3 + $0x4d8] sm:$0xff]  ;;  %v406_v32 = vld [vmem:[%s4209_s3 + $0x450] sm:$0xff]  ;;  %v1146_v33 = vunpack.c.l.s4 %v2518_v48  ;;  %v424_v15 = vld [vmem:[%s4209_s3 + $0x4e0] sm:$0xff] }
  0xb6   :  { %853 = vmatprep.mubr.f32.mxu0 %v494_v0  ;;  %2241 = vmatpush3.bf16.msra.mxu1 %v2240_v62  ;;  %v2220_v57 = vpack.c.bf16 %v403_v50, %v402_v49  ;;  %v2252_v37 = vpack.c.bf16 %v435_v5, %v434_v4  ;;  %v2222_v13 = vpack.c.bf16 %v421_v44, %v420_v55  ;;  %v407_v23 = vld [vmem:[%s4209_s3 + $0x458] sm:$0xff]  ;;  %v438_v28 = vld [vmem:[%s4209_s3 + $0x550] sm:$0xff]  ;;  %v425_v16 = vld [vmem:[%s4209_s3 + $0x4e8] sm:$0xff] }
  0xb7   :  { %923 = vmatprep.mubr.f32.mxu1 %v496_v11  ;;  %2211 = vmatprep.subr.bf16.mxu0 %v2210_v41  ;;  %v2254_v47 = vpack.c.bf16 %v453_v25, %v452_v19  ;;  %v2224_v10 = vpack.c.bf16 %v405_v18, %v404_v17  ;;  %v2256_v54 = vpack.c.bf16 %v437_v53, %v436_v58  ;;  %v439_v3 = vld [vmem:[%s4209_s3 + $0x558] sm:$0xff]  ;;  %v456_v21 = vld [vmem:[%s4209_s3 + $0x5e0] sm:$0xff]  ;;  %v457_v43 = vld [vmem:[%s4209_s3 + $0x5e8] sm:$0xff]  ;;  %v1147_v63 = vunpack.c.0.s8 %v1146_v33 }
  0xb8   :  { %2243 = vmatprep.subr.bf16.mxu1 %v2242_v2  ;;  %v2226_v26 = vpack.c.bf16 %v423_v38, %v422_v9  ;;  %v2258_v62 = vpack.c.bf16 %v455_v27, %v454_v39  ;;  %v2228_v40 = vpack.c.bf16 %v407_v23, %v406_v32  ;;  %v2260_v41 = vpack.c.bf16 %v439_v3, %v438_v28  ;;  %v408_v1 = vld [vmem:[%s4209_s3 + $0x460] sm:$0xff]  ;;  %v409_v12 = vld [vmem:[%s4209_s3 + $0x468] sm:$0xff]  ;;  %v426_v61 = vld [vmem:[%s4209_s3 + $0x4f0] sm:$0xff] }
  0xb9   :  { %2213 = vmatpush3.bf16.msra.mxu0 %v2212_v56  ;;  %v2230_v52 = vpack.c.bf16 %v425_v16, %v424_v15  ;;  %v440_v35 = vld [vmem:[%s4209_s3 + $0x560] sm:$0xff]  ;;  %v2262_v2 = vpack.c.bf16 %v457_v43, %v456_v21  ;;  %v441_v60 = vld [vmem:[%s4209_s3 + $0x568] sm:$0xff]  ;;  %v427_v0 = vld [vmem:[%s4209_s3 + $0x4f8] sm:$0xff] }
  0xba   :  { %2245 = vmatpush3.bf16.msra.mxu1 %v2244_v29  ;;  %2215 = vmatprep.subr.bf16.mxu0 %v2214_v42  ;;  %v458_v56 = vld [vmem:[%s4209_s3 + $0x5f0] sm:$0xff]  ;;  %v459_v11 = vld [vmem:[%s4209_s3 + $0x5f8] sm:$0xff]  ;;  %v2232_v29 = vpack.c.bf16 %v409_v12, %v408_v1  ;;  %v939_v42 = vld [vmem:[%s4208_s2] sm:$0xff]  ;;  %v2264_v30 = vpack.c.bf16 %v441_v60, %v440_v35  ;;  %v2234_v22 = vpack.c.bf16 %v427_v0, %v426_v61 }
  0xbb   :  { %2247 = vmatprep.subr.bf16.mxu1 %v2246_v24  ;;  %v410_v51 = vld [vmem:[%s4209_s3 + $0x470] sm:$0xff]  ;;  %v411_v24 = vld [vmem:[%s4209_s3 + $0x478] sm:$0xff]  ;;  %v4247_v36 = vld [vmem:[#allocation8_spill] sm:$0xff]  ;;  %v2266_v8 = vpack.c.bf16 %v459_v11, %v458_v56  ;;  %v1144_v50 = vcombine.high %v939_v42, %v939_v42 }
  0xbc   :  { %v442_v14 = vld [vmem:[%s4209_s3 + $0x570] sm:$0xff]  ;;  %v3551_v20 = vsub.s32 %v1147_v63, %v4247_v36  ;;  %v443_v34 = vld [vmem:[%s4209_s3 + $0x578] sm:$0xff]  ;;  %v991_v49 = vld [vmem:[%s4211_s5 + $0x188] sm:$0xff]  ;;  %v2236_v4 = vpack.c.bf16 %v411_v24, %v410_v51 }
  0xbd   :  { %2217 = vmatpush3.bf16.msra.mxu0 %v2216_v6  ;;  %v958_v6 = vld [vmem:[%s4211_s5 + $0x80] sm:$0xff]  ;;  %v943_v44 = vld [vmem:[%s4211_s5 + $0x8] sm:$0xff]  ;;  %v992_v18 = vld [vmem:[%s4211_s5 + $0x190] sm:$0xff] }
  0xbe   :  { %2249 = vmatpush3.bf16.msra.mxu1 %v2248_v7  ;;  %2219 = vmatprep.subr.bf16.mxu0 %v2218_v31  ;;  %v959_v7 = vld [vmem:[%s4211_s5 + $0x88] sm:$0xff]  ;;  %v990_v31 = vld [vmem:[%s4211_s5 + $0x180] sm:$0xff]  ;;  %v3587_v17 = vrot.slane %v939_v42, %v3551_v20  ;;  %v993_v58 = vld [vmem:[%s4211_s5 + $0x198] sm:$0xff] }
  0xbf   :  { %2251 = vmatprep.subr.bf16.mxu1 %v2250_v46  ;;  %v2268_v46 = vpack.c.bf16 %v443_v34, %v442_v14  ;;  %v2270_v5 = vpack.c.bf16 %v959_v7, %v958_v6  ;;  %v942_v55 = vld [vmem:[%s4211_s5] sm:$0xff]  ;;  %v2302_v25 = vpack.c.bf16 %v991_v49, %v990_v31  ;;  %v944_v39 = vld [vmem:[%s4211_s5 + $0x10] sm:$0xff]  ;;  %v945_v27 = vld [vmem:[%s4211_s5 + $0x18] sm:$0xff] }
  0xc0   :  { %v974_v19 = vld [vmem:[%s4211_s5 + $0x100] sm:$0xff]  ;;  %v2272_v53 = vpack.c.bf16 %v943_v44, %v942_v55  ;;  %v963_v23 = vld [vmem:[%s4211_s5 + $0xa8] sm:$0xff]  ;;  %v1159_v28 = vcombine.high %v3587_v17, %v3587_v17  ;;  %v2276_v3 = vpack.c.bf16 %v945_v27, %v944_v39  ;;  %v996_v1 = vld [vmem:[%s4211_s5 + $0x1b0] sm:$0xff] }
  0xc1   :  { %2221 = vmatpush3.bf16.msra.mxu0 %v2220_v57  ;;  %v975_v57 = vld [vmem:[%s4211_s5 + $0x108] sm:$0xff]  ;;  %v962_v32 = vld [vmem:[%s4211_s5 + $0xa0] sm:$0xff]  ;;  %v997_v12 = vld [vmem:[%s4211_s5 + $0x1b8] sm:$0xff] }
  0xc2   :  { %2253 = vmatpush3.bf16.msra.mxu1 %v2252_v37  ;;  %2223 = vmatprep.subr.bf16.mxu0 %v2222_v13  ;;  %v960_v37 = vld [vmem:[%s4211_s5 + $0x90] sm:$0xff]  ;;  %v961_v13 = vld [vmem:[%s4211_s5 + $0x98] sm:$0xff]  ;;  %v2304_v9 = vpack.c.bf16 %v975_v57, %v974_v19  ;;  %v994_v48 = vld [vmem:[%s4211_s5 + $0x1a0] sm:$0xff]  ;;  %v2278_v16 = vpack.c.bf16 %v963_v23, %v962_v32  ;;  %v2314_v56 = vpack.c.bf16 %v997_v12, %v996_v1 }
  0xc3   :  { %2255 = vmatprep.subr.bf16.mxu1 %v2254_v47  ;;  %v3596_v47 = vrot.slane %v1144_v50, %v3551_v20  ;;  %v2274_v38 = vpack.c.bf16 %v961_v13, %v960_v37  ;;  %v995_v33 = vld [vmem:[%s4211_s5 + $0x1a8] sm:$0xff]  ;;  %v978_v43 = vld [vmem:[%s4211_s5 + $0x120] sm:$0xff]  ;;  %v948_v60 = vld [vmem:[%s4211_s5 + $0x30] sm:$0xff] }
  0xc4   :  { %v947_v21 = vld [vmem:[%s4211_s5 + $0x28] sm:$0xff]  ;;  %v949_v61 = vld [vmem:[%s4211_s5 + $0x38] sm:$0xff]  ;;  %v980_v0 = vld [vmem:[%s4211_s5 + $0x130] sm:$0xff] }
  0xc5   :  { %2225 = vmatpush3.bf16.msra.mxu0 %v2224_v10  ;;  %v976_v10 = vld [vmem:[%s4211_s5 + $0x110] sm:$0xff]  ;;  %v981_v11 = vld [vmem:[%s4211_s5 + $0x138] sm:$0xff]  ;;  %v967_v42 = vld [vmem:[%s4211_s5 + $0xc8] sm:$0xff]  ;;  %v2284_v51 = vpack.c.bf16 %v949_v61, %v948_v60 }
  0xc6   :  { %2257 = vmatpush3.bf16.msra.mxu1 %v2256_v54  ;;  %2227 = vmatprep.subr.bf16.mxu0 %v2226_v26  ;;  %v2306_v54 = vpack.c.bf16 %v993_v58, %v992_v18  ;;  %v977_v26 = vld [vmem:[%s4211_s5 + $0x118] sm:$0xff]  ;;  %v2316_v24 = vpack.c.bf16 %v981_v11, %v980_v0  ;;  %v950_v36 = vld [vmem:[%s4211_s5 + $0x40] sm:$0xff]  ;;  %v983_v7 = vld [vmem:[%s4211_s5 + $0x148] sm:$0xff] }
  0xc7   :  { %2259 = vmatprep.subr.bf16.mxu1 %v2258_v62  ;;  %v1160_v62 = vcombine.high %v3596_v47, %v3596_v47  ;;  %v2308_v15 = vpack.c.bf16 %v977_v26, %v976_v10  ;;  %v982_v34 = vld [vmem:[%s4211_s5 + $0x140] sm:$0xff]  ;;  %v968_v31 = vld [vmem:[%s4211_s5 + $0xd0] sm:$0xff]  ;;  %v969_v49 = vld [vmem:[%s4211_s5 + $0xd8] sm:$0xff] }
  0xc8   :  { %v1000_v50 = vld [vmem:[%s4211_s5 + $0x1d0] sm:$0xff]  ;;  %v2290_v55 = vpack.c.bf16 %v969_v49, %v968_v31  ;;  %v953_v19 = vld [vmem:[%s4211_s5 + $0x58] sm:$0xff]  ;;  %v970_v13 = vld [vmem:[%s4211_s5 + $0xe0] sm:$0xff] }
  0xc9   :  { %2229 = vmatpush3.bf16.msra.mxu0 %v2228_v40  ;;  %v979_v40 = vld [vmem:[%s4211_s5 + $0x128] sm:$0xff]  ;;  %v952_v44 = vld [vmem:[%s4211_s5 + $0x50] sm:$0xff]  ;;  %v985_v37 = vld [vmem:[%s4211_s5 + $0x158] sm:$0xff] }
  0xca   :  { %2261 = vmatpush3.bf16.msra.mxu1 %v2260_v41  ;;  %2231 = vmatprep.subr.bf16.mxu0 %v2230_v52  ;;  %v964_v41 = vld [vmem:[%s4211_s5 + $0xb0] sm:$0xff]  ;;  %v965_v52 = vld [vmem:[%s4211_s5 + $0xb8] sm:$0xff]  ;;  %v2312_v63 = vpack.c.bf16 %v979_v40, %v978_v43  ;;  %v971_v18 = vld [vmem:[%s4211_s5 + $0xe8] sm:$0xff] }
  0xcb   :  { %2263 = vmatprep.subr.bf16.mxu1 %v2262_v2  ;;  %v2282_v2 = vpack.c.bf16 %v965_v52, %v964_v41  ;;  %v1002_v58 = vld [vmem:[%s4211_s5 + $0x1e0] sm:$0xff]  ;;  %v2294_v39 = vpack.c.bf16 %v971_v18, %v970_v13  ;;  %v955_v10 = vld [vmem:[%s4211_s5 + $0x68] sm:$0xff]  ;;  %v972_v23 = vld [vmem:[%s4211_s5 + $0xf0] sm:$0xff] }
  0xcc   :  { %v954_v27 = vld [vmem:[%s4211_s5 + $0x60] sm:$0xff]  ;;  %v987_v32 = vld [vmem:[%s4211_s5 + $0x168] sm:$0xff]  ;;  %v988_v43 = vld [vmem:[%s4211_s5 + $0x170] sm:$0xff] }
  0xcd   :  { %2233 = vmatpush3.bf16.msra.mxu0 %v2232_v29  ;;  %v966_v29 = vld [vmem:[%s4211_s5 + $0xc0] sm:$0xff]  ;;  %v989_v40 = vld [vmem:[%s4211_s5 + $0x178] sm:$0xff]  ;;  %v1023_v52 = vld [vmem:[%s4211_s5 + $0x288] sm:$0xff] }
  0xce   :  { %2265 = vmatpush3.bf16.msra.mxu1 %v2264_v30  ;;  %2235 = vmatprep.subr.bf16.mxu0 %v2234_v22  ;;  %v998_v30 = vld [vmem:[%s4211_s5 + $0x1c0] sm:$0xff]  ;;  %v999_v22 = vld [vmem:[%s4211_s5 + $0x1c8] sm:$0xff]  ;;  %v2286_v14 = vpack.c.bf16 %v967_v42, %v966_v29  ;;  %v1024_v42 = vld [vmem:[%s4211_s5 + $0x290] sm:$0xff] }
  0xcf   :  { %2267 = vmatprep.subr.bf16.mxu1 %v2266_v8  ;;  %v951_v8 = vld [vmem:[%s4211_s5 + $0x48] sm:$0xff]  ;;  %v2318_v6 = vpack.c.bf16 %v999_v22, %v998_v30  ;;  %v1022_v41 = vld [vmem:[%s4211_s5 + $0x280] sm:$0xff]  ;;  %v1025_v30 = vld [vmem:[%s4211_s5 + $0x298] sm:$0xff] }
  0xd0   :  { %v1054_v1 = vld [vmem:[%s4211_s5 + $0x380] sm:$0xff]  ;;  %v1055_v12 = vld [vmem:[%s4211_s5 + $0x388] sm:$0xff]  ;;  %v2334_v60 = vpack.c.bf16 %v1023_v52, %v1022_v41  ;;  %v1040_v31 = vld [vmem:[%s4211_s5 + $0x310] sm:$0xff] }
  0xd1   :  { %2237 = vmatpush3.bf16.msra.mxu0 %v2236_v4  ;;  %v1001_v4 = vld [vmem:[%s4211_s5 + $0x1d8] sm:$0xff]  ;;  %v1006_v61 = vld [vmem:[%s4211_s5 + $0x200] sm:$0xff]  ;;  %v1007_v0 = vld [vmem:[%s4211_s5 + $0x208] sm:$0xff]  ;;  %v2366_v11 = vpack.c.bf16 %v1055_v12, %v1054_v1 }
  0xd2   :  { %2269 = vmatpush3.bf16.msra.mxu1 %v2268_v46  ;;  %2271 = vmatprep.subr.bf16.mxu0 %v2270_v5  ;;  %v2288_v46 = vpack.c.bf16 %v951_v8, %v950_v36  ;;  %v2320_v5 = vpack.c.bf16 %v983_v7, %v982_v34  ;;  %v2322_v57 = vpack.c.bf16 %v1001_v4, %v1000_v50  ;;  %v1039_v29 = vld [vmem:[%s4211_s5 + $0x308] sm:$0xff]  ;;  %v1009_v7 = vld [vmem:[%s4211_s5 + $0x218] sm:$0xff]  ;;  %v1026_v4 = vld [vmem:[%s4211_s5 + $0x2a0] sm:$0xff] }
  0xd3   :  { %2303 = vmatprep.subr.bf16.mxu1 %v2302_v25  ;;  %v984_v25 = vld [vmem:[%s4211_s5 + $0x150] sm:$0xff]  ;;  %v2336_v36 = vpack.c.bf16 %v1007_v0, %v1006_v61  ;;  %v2338_v34 = vpack.c.bf16 %v1025_v30, %v1024_v42  ;;  %v1041_v50 = vld [vmem:[%s4211_s5 + $0x318] sm:$0xff]  ;;  %v1011_v13 = vld [vmem:[%s4211_s5 + $0x228] sm:$0xff] }
  0xd4   :  { %854 = vmatmul.mubr.f32.vlgmr.msra.gmra.mrb[4].mxu0 %v3361_v45  ;;  %v946_v45 = vld [vmem:[%s4211_s5 + $0x20] sm:$0xff]  ;;  %v1047_v52 = vld [vmem:[%s4211_s5 + $0x348] sm:$0xff]  ;;  %v1032_v1 = vld [vmem:[%s4211_s5 + $0x2d0] sm:$0xff] }
  0xd5   :  { %924 = vmatmul.mubr.f32.vlgmr.msra.gmra.mrb[4].mxu1 %v3407_v59  ;;  %2273 = vmatpush3.bf16.msra.mxu0 %v2272_v53  ;;  %v2310_v59 = vpack.c.bf16 %v995_v33, %v994_v48  ;;  %v2280_v35 = vpack.c.bf16 %v947_v21, %v946_v45  ;;  %v1003_v53 = vld [vmem:[%s4211_s5 + $0x1e8] sm:$0xff]  ;;  %v1004_v48 = vld [vmem:[%s4211_s5 + $0x1f0] sm:$0xff]  ;;  %v1005_v33 = vld [vmem:[%s4211_s5 + $0x1f8] sm:$0xff] }
  0xd6   :  { %2305 = vmatpush3.bf16.msra.mxu1 %v2304_v9  ;;  %2275 = vmatprep.subr.bf16.mxu0 %v2274_v38  ;;  %v2292_v9 = vpack.c.bf16 %v953_v19, %v952_v44  ;;  %v2324_v38 = vpack.c.bf16 %v985_v37, %v984_v25  ;;  %v2326_v26 = vpack.c.bf16 %v1003_v53, %v1002_v58  ;;  %v956_v45 = vld [vmem:[%s4211_s5 + $0x70] sm:$0xff]  ;;  %v957_v21 = vld [vmem:[%s4211_s5 + $0x78] sm:$0xff]  ;;  %v1059_v44 = vld [vmem:[%s4211_s5 + $0x3a8] sm:$0xff] }
  0xd7   :  { %2307 = vmatprep.subr.bf16.mxu1 %v2306_v54  ;;  %1271 = vmatprep.mubr.f32.mxu0 %v1159_v28  ;;  %v986_v54 = vld [vmem:[%s4211_s5 + $0x160] sm:$0xff]  ;;  %v973_v28 = vld [vmem:[%s4211_s5 + $0xf8] sm:$0xff]  ;;  %v1028_v53 = vld [vmem:[%s4211_s5 + $0x2b0] sm:$0xff] }
  0xd8   :  { %1341 = vmatprep.mubr.f32.mxu1 %v1160_v62  ;;  %v2296_v62 = vpack.c.bf16 %v955_v10, %v954_v27  ;;  %v1042_v18 = vld [vmem:[%s4211_s5 + $0x320] sm:$0xff]  ;;  %v1033_v12 = vld [vmem:[%s4211_s5 + $0x2d8] sm:$0xff]  ;;  %v1016_v0 = vld [vmem:[%s4211_s5 + $0x250] sm:$0xff] }
  0xd9   :  { %2277 = vmatpush3.bf16.msra.mxu0 %v2276_v3  ;;  %v940_v3 = vld [vmem:[%s4208_s2 + $0x8] sm:$0xff]  ;;  %v2354_v61 = vpack.c.bf16 %v1033_v12, %v1032_v1  ;;  %v1049_v42 = vld [vmem:[%s4211_s5 + $0x358] sm:$0xff]  ;;  %v1034_v30 = vld [vmem:[%s4211_s5 + $0x2e0] sm:$0xff] }
  0xda   :  { %2309 = vmatpush3.bf16.msra.mxu1 %v2308_v15  ;;  %2279 = vmatprep.subr.bf16.mxu0 %v2278_v16  ;;  %v2328_v15 = vpack.c.bf16 %v987_v32, %v986_v54  ;;  %v2298_v16 = vpack.c.bf16 %v973_v28, %v972_v23  ;;  %v3794_v22 = vrot.slane %v940_v3, %v3551_v20  ;;  %v1013_v32 = vld [vmem:[%s4211_s5 + $0x238] sm:$0xff]  ;;  %v1044_v23 = vld [vmem:[%s4211_s5 + $0x330] sm:$0xff] }
  0xdb   :  { %2311 = vmatprep.subr.bf16.mxu1 %v2310_v59  ;;  %v2330_v59 = vpack.c.bf16 %v1005_v33, %v1004_v48  ;;  %v1045_v48 = vld [vmem:[%s4211_s5 + $0x338] sm:$0xff]  ;;  %v1030_v33 = vld [vmem:[%s4211_s5 + $0x2c0] sm:$0xff]  ;;  %v1104_v1 = vld [vmem:[%s4211_s5 + $0x510] sm:$0xff] }
  0xdc   :  { %v1105_v12 = vld [vmem:[%s4211_s5 + $0x518] sm:$0xff] }
  0xdd   :  { %2281 = vmatpush3.bf16.msra.mxu0 %v2280_v35  ;;  %v1161_v35 = vcombine.high %v940_v3, %v940_v3  ;;  %v1062_v3 = vld [vmem:[%s4211_s5 + $0x3c0] sm:$0xff] }
  0xde   :  { %2313 = vmatpush3.bf16.msra.mxu1 %v2312_v63  ;;  %2283 = vmatprep.subr.bf16.mxu0 %v2282_v2  ;;  %v2300_v63 = vpack.c.bf16 %v957_v21, %v956_v45  ;;  %v2332_v2 = vpack.c.bf16 %v989_v40, %v988_v43  ;;  %v2380_v45 = vpack.c.bf16 %v1045_v48, %v1044_v23  ;;  %v1014_v43 = vld [vmem:[%s4211_s5 + $0x240] sm:$0xff]  ;;  %v1071_v23 = vld [vmem:[%s4211_s5 + $0x408] sm:$0xff] }
  0xdf   :  { %2315 = vmatprep.subr.bf16.mxu1 %v2314_v56  ;;  %v1038_v56 = vld [vmem:[%s4211_s5 + $0x300] sm:$0xff] }
  0xe0   :  { %v2368_v8 = vpack.c.bf16 %v1039_v29, %v1038_v56  ;;  %v1046_v40 = vld [vmem:[%s4211_s5 + $0x340] sm:$0xff]  ;;  %v1017_v56 = vld [vmem:[%s4211_s5 + $0x258] sm:$0xff] }
  0xe1   :  { %2285 = vmatpush3.bf16.msra.mxu0 %v2284_v51  ;;  %v1056_v51 = vld [vmem:[%s4211_s5 + $0x390] sm:$0xff] }
  0xe2   :  { %2317 = vmatpush3.bf16.msra.mxu1 %v2316_v24  ;;  %2287 = vmatprep.subr.bf16.mxu0 %v2286_v14  ;;  %v1057_v24 = vld [vmem:[%s4211_s5 + $0x398] sm:$0xff]  ;;  %v3803_v14 = vrot.slane %v1161_v35, %v3551_v20  ;;  %v1064_v35 = vld [vmem:[%s4211_s5 + $0x3d0] sm:$0xff] }
  0xe3   :  { %2319 = vmatprep.subr.bf16.mxu1 %v2318_v6  ;;  %v1008_v6 = vld [vmem:[%s4211_s5 + $0x210] sm:$0xff]  ;;  %v2370_v49 = vpack.c.bf16 %v1057_v24, %v1056_v51  ;;  %v1035_v51 = vld [vmem:[%s4211_s5 + $0x2e8] sm:$0xff]  ;;  %v1066_v24 = vld [vmem:[%s4211_s5 + $0x3e0] sm:$0xff] }
  0xe4   :  { %v1177_v19 = vcombine.high %v3803_v14, %v3803_v14  ;;  %v2340_v25 = vpack.c.bf16 %v1009_v7, %v1008_v6  ;;  %v2358_v6 = vpack.c.bf16 %v1035_v51, %v1034_v30  ;;  %v1018_v7 = vld [vmem:[%s4211_s5 + $0x260] sm:$0xff] }
  0xe5   :  { %2289 = vmatpush3.bf16.msra.mxu0 %v2288_v46  ;;  %v1027_v46 = vld [vmem:[%s4211_s5 + $0x2a8] sm:$0xff]  ;;  %v1106_v30 = vld [vmem:[%s4211_s5 + $0x520] sm:$0xff] }
  0xe6   :  { %2321 = vmatpush3.bf16.msra.mxu1 %v2320_v5  ;;  %2291 = vmatprep.subr.bf16.mxu0 %v2290_v55  ;;  %v1176_v5 = vcombine.high %v3794_v22, %v3794_v22  ;;  %v1058_v55 = vld [vmem:[%s4211_s5 + $0x3a0] sm:$0xff]  ;;  %v2342_v37 = vpack.c.bf16 %v1027_v46, %v1026_v4  ;;  %v1051_v4 = vld [vmem:[%s4211_s5 + $0x368] sm:$0xff]  ;;  %v1036_v46 = vld [vmem:[%s4211_s5 + $0x2f0] sm:$0xff] }
  0xe7   :  { %2323 = vmatprep.subr.bf16.mxu1 %v2322_v57  ;;  %v2372_v57 = vpack.c.bf16 %v1041_v50, %v1040_v31  ;;  %v2374_v58 = vpack.c.bf16 %v1059_v44, %v1058_v55  ;;  %v1019_v31 = vld [vmem:[%s4211_s5 + $0x268] sm:$0xff]  ;;  %v1068_v55 = vld [vmem:[%s4211_s5 + $0x3f0] sm:$0xff]  ;;  %v1069_v44 = vld [vmem:[%s4211_s5 + $0x3f8] sm:$0xff] }
  0xe9   :  { %2293 = vmatpush3.bf16.msra.mxu0 %v2292_v9  ;;  %v1029_v9 = vld [vmem:[%s4211_s5 + $0x2b8] sm:$0xff] }
  0xea   :  { %2325 = vmatpush3.bf16.msra.mxu1 %v2324_v38  ;;  %2295 = vmatprep.subr.bf16.mxu0 %v2294_v39  ;;  %v1060_v38 = vld [vmem:[%s4211_s5 + $0x3b0] sm:$0xff]  ;;  %v1061_v39 = vld [vmem:[%s4211_s5 + $0x3b8] sm:$0xff]  ;;  %v2346_v54 = vpack.c.bf16 %v1029_v9, %v1028_v53  ;;  %v1086_v53 = vld [vmem:[%s4211_s5 + $0x480] sm:$0xff] }
  0xeb   :  { %2327 = vmatprep.subr.bf16.mxu1 %v2326_v26  ;;  %v1012_v26 = vld [vmem:[%s4211_s5 + $0x230] sm:$0xff]  ;;  %v2378_v28 = vpack.c.bf16 %v1061_v39, %v1060_v38  ;;  %v1087_v9 = vld [vmem:[%s4211_s5 + $0x488] sm:$0xff]  ;;  %v1118_v38 = vld [vmem:[%s4211_s5 + $0x580] sm:$0xff] }
  0xec   :  { %v1119_v39 = vld [vmem:[%s4211_s5 + $0x588] sm:$0xff] }
  0xed   :  { %2297 = vmatpush3.bf16.msra.mxu0 %v2296_v62  ;;  %v1031_v62 = vld [vmem:[%s4211_s5 + $0x2c8] sm:$0xff]  ;;  %v2430_v48 = vpack.c.bf16 %v1119_v39, %v1118_v38  ;;  %v1097_v38 = vld [vmem:[%s4211_s5 + $0x4d8] sm:$0xff]  ;;  %v1128_v39 = vld [vmem:[%s4211_s5 + $0x5d0] sm:$0xff] }
  0xee   :  { %2329 = vmatpush3.bf16.msra.mxu1 %v2328_v15  ;;  %2299 = vmatprep.subr.bf16.mxu0 %v2298_v16  ;;  %v1063_v15 = vld [vmem:[%s4211_s5 + $0x3c8] sm:$0xff]  ;;  %v2348_v16 = vpack.c.bf16 %v1013_v32, %v1012_v26  ;;  %v2350_v21 = vpack.c.bf16 %v1031_v62, %v1030_v33  ;;  %v2398_v26 = vpack.c.bf16 %v1087_v9, %v1086_v53  ;;  %v1070_v32 = vld [vmem:[%s4211_s5 + $0x400] sm:$0xff]  ;;  %v1088_v62 = vld [vmem:[%s4211_s5 + $0x490] sm:$0xff] }
  0xef   :  { %2331 = vmatprep.subr.bf16.mxu1 %v2330_v59  ;;  %v1015_v59 = vld [vmem:[%s4211_s5 + $0x248] sm:$0xff]  ;;  %v2382_v41 = vpack.c.bf16 %v1063_v15, %v1062_v3  ;;  %v1089_v3 = vld [vmem:[%s4211_s5 + $0x498] sm:$0xff]  ;;  %v1096_v9 = vld [vmem:[%s4211_s5 + $0x4d0] sm:$0xff] }
  0xf0   :  { %v1103_v33 = vld [vmem:[%s4211_s5 + $0x508] sm:$0xff] }
  0xf1   :  { %2301 = vmatpush3.bf16.msra.mxu0 %v2300_v63  ;;  %v1065_v63 = vld [vmem:[%s4211_s5 + $0x3d8] sm:$0xff]  ;;  %v1111_v53 = vld [vmem:[%s4211_s5 + $0x548] sm:$0xff] }
  0xf2   :  { %2333 = vmatpush3.bf16.msra.mxu1 %v2332_v2  ;;  %2335 = vmatprep.subr.bf16.mxu0 %v2334_v60  ;;  %v2352_v2 = vpack.c.bf16 %v1015_v59, %v1014_v43  ;;  %v2384_v60 = vpack.c.bf16 %v1047_v52, %v1046_v40  ;;  %v2386_v29 = vpack.c.bf16 %v1065_v63, %v1064_v35  ;;  %v1073_v52 = vld [vmem:[%s4211_s5 + $0x418] sm:$0xff]  ;;  %v1090_v35 = vld [vmem:[%s4211_s5 + $0x4a0] sm:$0xff]  ;;  %v1091_v63 = vld [vmem:[%s4211_s5 + $0x4a8] sm:$0xff] }
  0xf3   :  { %2367 = vmatprep.subr.bf16.mxu1 %v2366_v11  ;;  %v1048_v11 = vld [vmem:[%s4211_s5 + $0x350] sm:$0xff]  ;;  %v2400_v43 = vpack.c.bf16 %v1071_v23, %v1070_v32  ;;  %v2402_v40 = vpack.c.bf16 %v1089_v3, %v1088_v62  ;;  %v1081_v23 = vld [vmem:[%s4211_s5 + $0x458] sm:$0xff]  ;;  %v1098_v62 = vld [vmem:[%s4211_s5 + $0x4e0] sm:$0xff] }
  0xf4   :  { %1272 = vmatmul.mubr.f32.vlgmr.msra.gmra.mrb[6].mxu0 %v3587_v17  ;;  %v1010_v17 = vld [vmem:[%s4211_s5 + $0x220] sm:$0xff]  ;;  %v1080_v32 = vld [vmem:[%s4211_s5 + $0x450] sm:$0xff]  ;;  %v1099_v3 = vld [vmem:[%s4211_s5 + $0x4e8] sm:$0xff] }
  0xf5   :  { %2337 = vmatpush3.bf16.msra.mxu0 %v2336_v36  ;;  %1342 = vmatmul.mubr.f32.vlgmr.msra.gmra.mrb[6].mxu1 %v3596_v47  ;;  %v1043_v47 = vld [vmem:[%s4211_s5 + $0x328] sm:$0xff]  ;;  %v2344_v27 = vpack.c.bf16 %v1011_v13, %v1010_v17  ;;  %v1020_v17 = vld [vmem:[%s4211_s5 + $0x270] sm:$0xff]  ;;  %v1021_v13 = vld [vmem:[%s4211_s5 + $0x278] sm:$0xff] }
  0xf6   :  { %2369 = vmatpush3.bf16.msra.mxu1 %v2368_v8  ;;  %2339 = vmatprep.subr.bf16.mxu0 %v2338_v34  ;;  %v2376_v10 = vpack.c.bf16 %v1043_v47, %v1042_v18  ;;  %v1067_v36 = vld [vmem:[%s4211_s5 + $0x3e8] sm:$0xff]  ;;  %v2356_v8 = vpack.c.bf16 %v1017_v56, %v1016_v0  ;;  %v2388_v34 = vpack.c.bf16 %v1049_v42, %v1048_v11  ;;  %v1052_v18 = vld [vmem:[%s4211_s5 + $0x370] sm:$0xff]  ;;  %v1053_v47 = vld [vmem:[%s4211_s5 + $0x378] sm:$0xff] }
  0xf7   :  { %2371 = vmatprep.subr.bf16.mxu1 %v2370_v49  ;;  %1411 = vmatprep.mubr.f32.mxu0 %v1176_v5  ;;  %v1050_v49 = vld [vmem:[%s4211_s5 + $0x360] sm:$0xff]  ;;  %v2390_v50 = vpack.c.bf16 %v1067_v36, %v1066_v24  ;;  %v1037_v5 = vld [vmem:[%s4211_s5 + $0x2f8] sm:$0xff]  ;;  %v2436_v11 = vpack.c.bf16 %v1105_v12, %v1104_v1  ;;  %v1075_v42 = vld [vmem:[%s4211_s5 + $0x428] sm:$0xff] }
  0xf8   :  { %1481 = vmatprep.mubr.f32.mxu1 %v1177_v19  ;;  %v2360_v19 = vpack.c.bf16 %v1019_v31, %v1018_v7  ;;  %v1092_v24 = vld [vmem:[%s4211_s5 + $0x4b0] sm:$0xff]  ;;  %v1093_v36 = vld [vmem:[%s4211_s5 + $0x4b8] sm:$0xff]  ;;  %v1114_v1 = vld [vmem:[%s4211_s5 + $0x560] sm:$0xff] }
  0xf9   :  { %2341 = vmatpush3.bf16.msra.mxu0 %v2340_v25  ;;  %v941_v25 = vld [vmem:[%s4208_s2 + $0x10] sm:$0xff]  ;;  %v2410_v31 = vpack.c.bf16 %v1093_v36, %v1092_v24  ;;  %v1115_v12 = vld [vmem:[%s4211_s5 + $0x568] sm:$0xff]  ;;  %s2519_s2 = smov [#allocation2]  }
  0xfa   :  { %2373 = vmatpush3.bf16.msra.mxu1 %v2372_v57  ;;  %2343 = vmatprep.subr.bf16.mxu0 %v2342_v37  ;;  %v2392_v57 = vpack.c.bf16 %v1051_v4, %v1050_v49  ;;  %v2362_v37 = vpack.c.bf16 %v1037_v5, %v1036_v46  ;;  %v4001_v15 = vrot.slane %v941_v25, %v3551_v20  ;;  %v1076_v49 = vld [vmem:[%s4211_s5 + $0x430] sm:$0xff]  ;;  %v1109_v5 = vld [vmem:[%s4211_s5 + $0x538] sm:$0xff]  ;;  %s1634_s28 = sshll.u32 %s2519_s2, 4  ;;  %s1635_s28 = int_to_ptr.vmem [resolvable:$true] %s1634_s28 }
  0xfb   :  { %2375 = vmatprep.subr.bf16.mxu1 %v2374_v58  ;;  %v2394_v58 = vpack.c.bf16 %v1069_v44, %v1068_v55  ;;  %v1108_v4 = vld [vmem:[%s4211_s5 + $0x530] sm:$0xff]  ;;  %v1094_v55 = vld [vmem:[%s4211_s5 + $0x4c0] sm:$0xff]  ;;  %v1095_v44 = vld [vmem:[%s4211_s5 + $0x4c8] sm:$0xff]  ;;  %s2470_s29 = scalar_lea.vmem %s1635_s28, 32  ;;  %p2475_p1 = scmp.lt.s32.totalorder %s1635_s28, %s1635_s28 }
  0xfc   :  { %p2471_p0 = scmp.ne.s32.totalorder %s1635_s28, %s2470_s29  ;;  %p2476_p2 = scmp.lt.s32.totalorder %s2470_s29, %s2470_s29 }
  0xfd   :  { %2345 = vmatpush3.bf16.msra.mxu0 %v2344_v27  ;;  %v1178_v27 = vcombine.high %v941_v25, %v941_v25  ;;  %v1127_v25 = vld [vmem:[%s4211_s5 + $0x5c8] sm:$0xff] }
  0xfe   :  { %2377 = vmatpush3.bf16.msra.mxu1 %v2376_v10  ;;  %2347 = vmatprep.subr.bf16.mxu0 %v2346_v54  ;;  %v2364_v10 = vpack.c.bf16 %v1021_v13, %v1020_v17  ;;  %v2396_v54 = vpack.c.bf16 %v1053_v47, %v1052_v18  ;;  %v2414_v17 = vpack.c.bf16 %v1095_v44, %v1094_v55  ;;  %v1078_v13 = vld [vmem:[%s4211_s5 + $0x440] sm:$0xff]  ;;  %v1079_v18 = vld [vmem:[%s4211_s5 + $0x448] sm:$0xff]  ;;  %p2477_p3 = por %p2476_p2, %p2475_p1 }
  0xff   :  { %2379 = vmatprep.subr.bf16.mxu1 %v2378_v28  ;;  %v1102_v28 = vld [vmem:[%s4211_s5 + $0x500] sm:$0xff] }
 0x100   :  { %v2432_v59 = vpack.c.bf16 %v1103_v33, %v1102_v28  ;;  %v1112_v28 = vld [vmem:[%s4211_s5 + $0x550] sm:$0xff]  ;;  %v1113_v33 = vld [vmem:[%s4211_s5 + $0x558] sm:$0xff]  ;;  %p2478_p4 = pnand %p2477_p3, %p2471_p0 }
 0x101   :  { %2349 = vmatpush3.bf16.msra.mxu0 %v2348_v16  ;;  %v1120_v16 = vld [vmem:[%s4211_s5 + $0x590] sm:$0xff] }
 0x102   :  { %2381 = vmatpush3.bf16.msra.mxu1 %v2380_v45  ;;  %2351 = vmatprep.subr.bf16.mxu0 %v2350_v21  ;;  %v1121_v45 = vld [vmem:[%s4211_s5 + $0x598] sm:$0xff]  ;;  %v4010_v21 = vrot.slane %v1178_v27, %v3551_v20 }
 0x103   :  { %2383 = vmatprep.subr.bf16.mxu1 %v2382_v41  ;;  %v1072_v41 = vld [vmem:[%s4211_s5 + $0x410] sm:$0xff]  ;;  %v2434_v20 = vpack.c.bf16 %v1121_v45, %v1120_v16  ;;  %v1129_v27 = vld [vmem:[%s4211_s5 + $0x5d8] sm:$0xff]  ;;  %v1130_v16 = vld [vmem:[%s4211_s5 + $0x5e0] sm:$0xff] }
 0x104   :  { %v1194_v0 = vcombine.high %v4010_v21, %v4010_v21  ;;  %v2404_v56 = vpack.c.bf16 %v1073_v52, %v1072_v41  ;;  %v1131_v45 = vld [vmem:[%s4211_s5 + $0x5e8] sm:$0xff]  ;;  %v1082_v41 = vld [vmem:[%s4211_s5 + $0x460] sm:$0xff] }
 0x105   :  { %2353 = vmatpush3.bf16.msra.mxu0 %v2352_v2  ;;  %v1193_v2 = vcombine.high %v4001_v15, %v4001_v15  ;;  %v1083_v52 = vld [vmem:[%s4211_s5 + $0x468] sm:$0xff] }
 0x106   :  { %2385 = vmatpush3.bf16.msra.mxu1 %v2384_v60  ;;  %2355 = vmatprep.subr.bf16.mxu0 %v2354_v61  ;;  %v1122_v60 = vld [vmem:[%s4211_s5 + $0x5a0] sm:$0xff]  ;;  %v1123_v61 = vld [vmem:[%s4211_s5 + $0x5a8] sm:$0xff] }
 0x107   :  { %2387 = vmatprep.subr.bf16.mxu1 %v2386_v29  ;;  %v2406_v29 = vpack.c.bf16 %v1091_v63, %v1090_v35  ;;  %v2438_v51 = vpack.c.bf16 %v1123_v61, %v1122_v60  ;;  %v1100_v35 = vld [vmem:[%s4211_s5 + $0x4f0] sm:$0xff]  ;;  %v1101_v63 = vld [vmem:[%s4211_s5 + $0x4f8] sm:$0xff]  ;;  %v2424_v61 = vpack.c.bf16 %v1083_v52, %v1082_v41 }
 0x108   :  { %v1133_v60 = vld [vmem:[%s4211_s5 + $0x5f8] sm:$0xff] }
 0x109   :  { %2357 = vmatpush3.bf16.msra.mxu0 %v2356_v8  ;;  %v1124_v8 = vld [vmem:[%s4211_s5 + $0x5b0] sm:$0xff] }
 0x10a   :  { %2389 = vmatpush3.bf16.msra.mxu1 %v2388_v34  ;;  %2359 = vmatprep.subr.bf16.mxu0 %v2358_v6  ;;  %v1125_v34 = vld [vmem:[%s4211_s5 + $0x5b8] sm:$0xff] }
 0x10b   :  { %2391 = vmatprep.subr.bf16.mxu1 %v2390_v50  ;;  %v1077_v50 = vld [vmem:[%s4211_s5 + $0x438] sm:$0xff]  ;;  %v2442_v46 = vpack.c.bf16 %v1125_v34, %v1124_v8 }
 0x10d   :  { %2361 = vmatpush3.bf16.msra.mxu0 %v2360_v19  ;;  %v1126_v19 = vld [vmem:[%s4211_s5 + $0x5c0] sm:$0xff] }
 0x10e   :  { %2393 = vmatpush3.bf16.msra.mxu1 %v2392_v57  ;;  %2363 = vmatprep.subr.bf16.mxu0 %v2362_v37  ;;  %v2412_v57 = vpack.c.bf16 %v1077_v50, %v1076_v49  ;;  %v2444_v37 = vpack.c.bf16 %v1109_v5, %v1108_v4  ;;  %v2446_v47 = vpack.c.bf16 %v1127_v25, %v1126_v19 }
 0x10f   :  { %2395 = vmatprep.subr.bf16.mxu1 %v2394_v58  ;;  %v1110_v58 = vld [vmem:[%s4211_s5 + $0x540] sm:$0xff] }
 0x111   :  { %2365 = vmatpush3.bf16.msra.mxu0 %v2364_v10  ;;  %v2416_v10 = vpack.c.bf16 %v1079_v18, %v1078_v13 }
 0x112   :  { %2397 = vmatpush3.bf16.msra.mxu1 %v2396_v54  ;;  %2399 = vmatprep.subr.bf16.mxu0 %v2398_v26  ;;  %v2448_v54 = vpack.c.bf16 %v1111_v53, %v1110_v58  ;;  %v2418_v26 = vpack.c.bf16 %v1097_v38, %v1096_v9  ;;  %v1656_v9 = vld [vmem:[%s4210_s4] ss:$0 sm:$0xff] }
 0x113   :  { %2431 = vmatprep.subr.bf16.mxu1 %v2430_v48  ;;  %v2450_v48 = vpack.c.bf16 %v1129_v27, %v1128_v39 }
 0x114   :  { %1412 = vmatmul.mubr.f32.vlgmr.msra.gmra.mrb[8].mxu0 %v3794_v22  ;;  %v1074_v22 = vld [vmem:[%s4211_s5 + $0x420] sm:$0xff] }
 0x115   :  { %2401 = vmatpush3.bf16.msra.mxu0 %v2400_v43  ;;  %1482 = vmatmul.mubr.f32.vlgmr.msra.gmra.mrb[8].mxu1 %v3803_v14  ;;  %v1107_v14 = vld [vmem:[%s4211_s5 + $0x528] sm:$0xff]  ;;  %v2408_v6 = vpack.c.bf16 %v1075_v42, %v1074_v22  ;;  %v2420_v43 = vpack.c.bf16 %v1081_v23, %v1080_v32  ;;  %v1116_v42 = vld [vmem:[%s4211_s5 + $0x570] sm:$0xff] }
 0x116   :  { %2433 = vmatpush3.bf16.msra.mxu1 %v2432_v59  ;;  %2403 = vmatprep.subr.bf16.mxu0 %v2402_v40  ;;  %v2440_v7 = vpack.c.bf16 %v1107_v14, %v1106_v30  ;;  %v2452_v59 = vpack.c.bf16 %v1113_v33, %v1112_v28  ;;  %v2422_v40 = vpack.c.bf16 %v1099_v3, %v1098_v62  ;;  %v1117_v30 = vld [vmem:[%s4211_s5 + $0x578] sm:$0xff] }
 0x117   :  { %2435 = vmatprep.subr.bf16.mxu1 %v2434_v20  ;;  %1551 = vmatprep.mubr.f32.mxu0 %v1193_v2  ;;  %v2454_v20 = vpack.c.bf16 %v1131_v45, %v1130_v16  ;;  %v1132_v2 = vld [vmem:[%s4211_s5 + $0x5f0] sm:$0xff]  ;;  %v2460_v14 = vpack.c.bf16 %v1117_v30, %v1116_v42 }
 0x118   :  { %1621 = vmatprep.mubr.f32.mxu1 %v1194_v0  ;;  %v2456_v0 = vpack.c.bf16 %v1115_v12, %v1114_v1  ;;  %v2458_v22 = vpack.c.bf16 %v1133_v60, %v1132_v2 }
 0x119   :  { %2405 = vmatpush3.bf16.msra.mxu0 %v2404_v56  ;;  %v2426_v56 = vpack.c.bf16 %v1101_v63, %v1100_v35 }
 0x11a   :  { %2437 = vmatpush3.bf16.msra.mxu1 %v2436_v11  ;;  %2407 = vmatprep.subr.bf16.mxu0 %v2406_v29  ;;  %v1084_v11 = vld [vmem:[%s4211_s5 + $0x470] sm:$0xff]  ;;  %v1085_v29 = vld [vmem:[%s4211_s5 + $0x478] sm:$0xff] }
 0x11b   :  { %2439 = vmatprep.subr.bf16.mxu1 %v2438_v51  ;;  %v2428_v51 = vpack.c.bf16 %v1085_v29, %v1084_v11 }
 0x11d   :  { %2409 = vmatpush3.bf16.msra.mxu0 %v2408_v6 }
 0x11e   :  { %2441 = vmatpush3.bf16.msra.mxu1 %v2440_v7  ;;  %2411 = vmatprep.subr.bf16.mxu0 %v2410_v31 }
 0x11f   :  { %2443 = vmatprep.subr.bf16.mxu1 %v2442_v46 }
 0x121   :  { %2413 = vmatpush3.bf16.msra.mxu0 %v2412_v57 }
 0x122   :  { %2445 = vmatpush3.bf16.msra.mxu1 %v2444_v37  ;;  %2415 = vmatprep.subr.bf16.mxu0 %v2414_v17 }
 0x123   :  { %2447 = vmatprep.subr.bf16.mxu1 %v2446_v47 }
 0x125   :  { %2417 = vmatpush3.bf16.msra.mxu0 %v2416_v10 }
 0x126   :  { %2449 = vmatpush3.bf16.msra.mxu1 %v2448_v54  ;;  %2419 = vmatprep.subr.bf16.mxu0 %v2418_v26 }
 0x127   :  { %2451 = vmatprep.subr.bf16.mxu1 %v2450_v48  ;;  %v34_v25 = vpop.xlane.xlu1 %33 }
 0x128   :  { %v35_v57 = vmax.f32 %v34_v25, 1.0 }
 0x129   :  { %2421 = vmatpush3.bf16.msra.mxu0 %v2420_v43 }
 0x12a   :  { %2453 = vmatpush3.bf16.msra.mxu1 %v2452_v59  ;;  %2423 = vmatprep.subr.bf16.mxu0 %v2422_v40  ;;  %2468 = vrcp.f32 %v35_v57 }
 0x12b   :  { %2455 = vmatprep.subr.bf16.mxu1 %v2454_v20 }
 0x12d   :  { %2425 = vmatpush3.bf16.msra.mxu0 %v2424_v61 }
 0x12e   :  { %2457 = vmatpush3.bf16.msra.mxu1 %v2456_v0  ;;  %2427 = vmatprep.subr.bf16.mxu0 %v2426_v56 }
 0x12f   :  { %2459 = vmatprep.subr.bf16.mxu1 %v2458_v22 }
 0x131   :  { %2429 = vmatpush3.bf16.msra.mxu0 %v2428_v51 }
 0x132   :  { %2461 = vmatpush3.bf16.msra.mxu1 %v2460_v14 }
 0x134   :  { %1552 = vmatmul.mubr.f32.vlgmr.msra.gmra.mrb[10].mxu0 %v4001_v15  ;;  %v2469_v47 = vpop.eup %2468 }
 0x135   :  { %1622 = vmatmul.mubr.f32.vlgmr.msra.gmra.mrb[10].mxu1 %v4010_v21 }
 0x163   :  { %v1690_v24 = vpop.f32.mrb[0].mxu0  ;;  %v1725_v36 = vpop.f32.mrb[0].mxu1 }
 0x164   :  { %v1691_v8 = vpop.f32.mrb[1].mxu0  ;;  %v1726_v34 = vpop.f32.mrb[1].mxu1 }
 0x165   :  { %v1692_v6 = vadd.f32 %v1691_v8, %v1690_v24  ;;  %v1727_v7 = vadd.f32 %v1726_v34, %v1725_v36 }
 0x167   :  { %v646_v31 = vadd.f32 %v1727_v7, %v1692_v6 }
 0x187   :  { %v1760_v49 = vpop.f32.mrb[2].mxu0 }
 0x188   :  { %v1795_v50 = vpop.f32.mrb[2].mxu1  ;;  %v1761_v4 = vpop.f32.mrb[3].mxu0 }
 0x189   :  { %v1762_v46 = vadd.f32 %v1761_v4, %v1760_v49  ;;  %v1796_v5 = vpop.f32.mrb[3].mxu1 }
 0x18a   :  { %v1797_v55 = vadd.f32 %v1796_v5, %v1795_v50 }
 0x18b   :  { %v716_v44 = vadd.f32 %v1762_v46, %v646_v31 }
 0x18d   :  { %v786_v19 = vadd.f32 %v1797_v55, %v716_v44 }
 0x1a7   :  { %v1830_v15 = vpop.f32.mrb[4].mxu0 }
 0x1a8   :  { %v1865_v21 = vpop.f32.mrb[4].mxu1  ;;  %v1831_v37 = vpop.f32.mrb[5].mxu0 }
 0x1a9   :  { %v1832_v17 = vadd.f32 %v1831_v37, %v1830_v15  ;;  %v1866_v13 = vpop.f32.mrb[5].mxu1 }
 0x1aa   :  { %v1867_v18 = vadd.f32 %v1866_v13, %v1865_v21 }
 0x1ab   :  { %v856_v58 = vadd.f32 %v1832_v17, %v786_v19 }
 0x1ad   :  { %v926_v53 = vadd.f32 %v1867_v18, %v856_v58 }
 0x1af   :  { %v929_v38 = vmul.f32 %v2469_v47, %v926_v53 }
 0x1b1   :  { %v937_v39 = vadd.f32 %v1656_v9, %v929_v38 }
 0x1b3   :  { %938 = vst [vmem:[#allocation2] sm:$0x3] %v937_v39 }
 0x1b4   :  { %2481 = shalt.err (!%p2478_p4)
}
 0x1b5   :  { %s2482_s0 = scalar_lea.hbm %s4213_s7, 32 }
 0x1b6   :  { %p2483_p5 = scmp.ne.s32.totalorder %s4213_s7, %s2482_s0  ;;  %p2486_p6 = scmp.lt.u32.totalorder %s2482_s0, %s4213_s7 }
 0x1b8   :  { %p2488_p7 = pnand %p2486_p6, %p2483_p5 }
 0x1ba   :  { %2491 = shalt.err (!%p2488_p7)
}
 0x1bb   :  { %1637 = dma.vmem_to_hbm [thread:$0]  %s1635_s28, 32, %s4213_s7, [#allocation3]   ;;  %v1657_v10 = vld [vmem:[%s4212_s6] ss:$0 sm:$0xff] }
 0x1bc   :  { %s2520_s6 = smov [#allocation4]  }
 0x1bd   :  { %s1644_s7 = sshll.u32 %s2520_s6, 4  ;;  %s1645_s7 = int_to_ptr.vmem [resolvable:$true] %s1644_s7 }
 0x1be   :  { %s2492_s17 = scalar_lea.vmem %s1645_s7, 32  ;;  %p2497_p9 = scmp.lt.s32.totalorder %s1645_s7, %s1645_s7 }
 0x1bf   :  { %p2493_p8 = scmp.ne.s32.totalorder %s1645_s7, %s2492_s17  ;;  %p2498_p10 = scmp.lt.s32.totalorder %s2492_s17, %s2492_s17 }
 0x1c1   :  { %p2499_p11 = por %p2498_p10, %p2497_p9 }
 0x1c3   :  { %p2500_p12 = pnand %p2499_p11, %p2493_p8 }
 0x1c7   :  { %v1900_v27 = vpop.f32.mrb[6].mxu0 }
 0x1c8   :  { %v1901_v54 = vpop.f32.mrb[7].mxu0  ;;  %v1935_v26 = vpop.f32.mrb[6].mxu1 }
 0x1c9   :  { %v1902_v32 = vadd.f32 %v1901_v54, %v1900_v27  ;;  %v1936_v23 = vpop.f32.mrb[7].mxu1 }
 0x1ca   :  { %v1937_v28 = vadd.f32 %v1936_v23, %v1935_v26 }
 0x1cb   :  { %v1274_v48 = vadd.f32 %v1902_v32, %v1657_v10 }
 0x1cd   :  { %v1344_v33 = vadd.f32 %v1937_v28, %v1274_v48 }
 0x1e7   :  { %v1970_v62 = vpop.f32.mrb[8].mxu0 }
 0x1e8   :  { %v1971_v3 = vpop.f32.mrb[9].mxu0  ;;  %v2005_v16 = vpop.f32.mrb[8].mxu1 }
 0x1e9   :  { %v1972_v45 = vadd.f32 %v1971_v3, %v1970_v62  ;;  %v2006_v43 = vpop.f32.mrb[9].mxu1 }
 0x1ea   :  { %v2007_v59 = vadd.f32 %v2006_v43, %v2005_v16 }
 0x1eb   :  { %v1414_v40 = vadd.f32 %v1972_v45, %v1344_v33 }
 0x1ed   :  { %v1484_v41 = vadd.f32 %v2007_v59, %v1414_v40 }
 0x207   :  { %v2040_v52 = vpop.f32.mrb[10].mxu0 }
 0x208   :  { %v2041_v1 = vpop.f32.mrb[11].mxu0  ;;  %v2075_v20 = vpop.f32.mrb[10].mxu1 }
 0x209   :  { %v2042_v12 = vadd.f32 %v2041_v1, %v2040_v52  ;;  %v2076_v35 = vpop.f32.mrb[11].mxu1 }
 0x20a   :  { %v2077_v63 = vadd.f32 %v2076_v35, %v2075_v20 }
 0x20b   :  { %v1554_v2 = vadd.f32 %v2042_v12, %v1484_v41 }
 0x20d   :  { %v1624_v60 = vadd.f32 %v2077_v63, %v1554_v2 }
 0x20f   :  { %1627 = vst [vmem:[#allocation4] sm:$0x3] %v1624_v60 }
 0x210   :  { %2503 = shalt.err (!%p2500_p12)
}
 0x211   :  { %s2504_s19 = scalar_lea.hbm %s4214_s8, 32 }
 0x212   :  { %p2505_p13 = scmp.ne.s32.totalorder %s4214_s8, %s2504_s19  ;;  %p2508_p0 = scmp.lt.u32.totalorder %s2504_s19, %s4214_s8 }
 0x214   :  { %p2510_p1 = pnand %p2508_p0, %p2505_p13 }
 0x216   :  { %2513 = shalt.err (!%p2510_p1)
}
 0x217   :  { %1647 = dma.vmem_to_hbm [thread:$0]  %s1645_s7, 32, %s4214_s8, [#allocation5]  }
 0x218   :  { %2514 = dma.done.wait [#allocation3], 32  }
 0x219   :  { %2515 = vsyncadd [#allocation3], 4294967264 }
 0x21a   :  { %2516 = dma.done.wait [#allocation5], 32  }
 0x21b   :  { %2517 = vsyncadd [#allocation5], 4294967264 }
 0x21c   :  { %1654 = vsyncpa [#allocation3], 1 }
 0x21d   :  { %1655 = vsyncpa [#allocation5], 1 }

</bundles_post_ra>
